<compile_context>
chip_gen: v5e
topology: v5e:2x2
jax: 0.10.0
libtpu: 0.0.40
codegen_flags: <defaults>
</compile_context>

<pallas_src>
import jax
import jax.numpy as jnp
from jax.experimental import pallas as pl
from jax.experimental.pallas import tpu as pltpu

BOARD_SIZE = 8
INPUT_SIZE = BOARD_SIZE * BOARD_SIZE                      # 64
PADDED_INPUT = 128                                        # lane-dense K
HIDDEN_SIZE1 = 128
HIDDEN_SIZE2 = 256
OUTPUT_SIZE = BOARD_SIZE ** 4                             # 4096


def _policy_kernel(x_ref,
                   w1_ref, b1_ref,
                   w2_ref, b2_ref,
                   w3_ref, b3_ref,
                   w4_ref, b4_ref,
                   out_ref):
    """Fused MLP forward: 3x (bf16 matmul + bias + relu), matmul + bias, softmax."""
    x = x_ref[...]                                        # (TB, 128) bf16

    # fc1 + relu   (accumulate in f32, re-quantize activations to bf16)
    h = jnp.dot(x, w1_ref[...], preferred_element_type=jnp.float32) + b1_ref[...]
    h = jnp.maximum(h, 0.0).astype(jnp.bfloat16)
    # fc2 + relu
    h = jnp.dot(h, w2_ref[...], preferred_element_type=jnp.float32) + b2_ref[...]
    h = jnp.maximum(h, 0.0).astype(jnp.bfloat16)
    # fc3 + relu
    h = jnp.dot(h, w3_ref[...], preferred_element_type=jnp.float32) + b3_ref[...]
    h = jnp.maximum(h, 0.0).astype(jnp.bfloat16)
    # fc4
    logits = jnp.dot(h, w4_ref[...], preferred_element_type=jnp.float32) + b4_ref[...]

    # numerically stable softmax over last dim; approx reciprocal -> EUP slot
    m = jnp.max(logits, axis=-1, keepdims=True)
    e = jnp.exp(logits - m)
    denom = jnp.sum(e, axis=-1, keepdims=True)
    out_ref[...] = (e * pl.reciprocal(denom, approx=True)).astype(out_ref.dtype)


def policy_network_forward(x, params, *, tb=None):
    """x: (B, INPUT_SIZE) float.  params: bf16 (in,out) weights, f32 (1,out) biases."""
    B = x.shape[0]

    # --- batch tile size: 128 for large B (feeds the MXU M dim), else pad B to x8 ---
    if tb is None:
        tb = 128 if B >= 128 else max(8, ((B + 7) // 8) * 8)
    b_pad = pl.cdiv(B, tb) * tb
    if b_pad != B:
        x = jnp.pad(x, ((0, b_pad - B), (0, 0)))

    # --- pad feature dim 64 -> 128 (w1 rows beyond 64 are zero, so result unchanged) ---
    if x.shape[1] < PADDED_INPUT:
        x = jnp.pad(x, ((0, 0), (0, PADDED_INPUT - x.shape[1])))
    x = x.astype(jnp.bfloat16)

    w1, b1 = params["w1"], params["b1"]
    w2, b2 = params["w2"], params["b2"]
    w3, b3 = params["w3"], params["b3"]
    w4, b4 = params["w4"], params["b4"]

    n_blocks = b_pad // tb

    # weights/biases: full array, constant block index -> DMA'd once, stay resident
    resident = lambda arr: pl.BlockSpec(arr.shape, lambda i: (0,) * arr.ndim)

    flops = 2 * b_pad * (PADDED_INPUT * HIDDEN_SIZE1
                         + HIDDEN_SIZE1 * HIDDEN_SIZE2
                         + HIDDEN_SIZE2 * HIDDEN_SIZE1
                         + HIDDEN_SIZE1 * OUTPUT_SIZE)
    weight_bytes = 2 * (PADDED_INPUT * HIDDEN_SIZE1 + HIDDEN_SIZE1 * HIDDEN_SIZE2
                        + HIDDEN_SIZE2 * HIDDEN_SIZE1 + HIDDEN_SIZE1 * OUTPUT_SIZE)
    bias_bytes = 4 * (HIDDEN_SIZE1 + HIDDEN_SIZE2 + HIDDEN_SIZE1 + OUTPUT_SIZE)
    bytes_accessed = (b_pad * PADDED_INPUT * 2          # x (bf16)
                      + weight_bytes + bias_bytes
                      + b_pad * OUTPUT_SIZE * 4)        # out (f32)
    cost = pl.CostEstimate(flops=flops,
                           transcendentals=b_pad * OUTPUT_SIZE,
                           bytes_accessed=bytes_accessed)

    out = pl.pallas_call(
        _policy_kernel,
        out_shape=jax.ShapeDtypeStruct((b_pad, OUTPUT_SIZE), jnp.float32),
        grid_spec=pltpu.PrefetchScalarGridSpec(
            num_scalar_prefetch=0,
            grid=(n_blocks,),
            in_specs=[pl.BlockSpec((tb, PADDED_INPUT), lambda i: (i, 0)),
                      resident(w1), resident(b1),
                      resident(w2), resident(b2),
                      resident(w3), resident(b3),
                      resident(w4), resident(b4)],
            out_specs=pl.BlockSpec((tb, OUTPUT_SIZE), lambda i: (i, 0)),
        ),
        compiler_params=pltpu.CompilerParams(
            dimension_semantics=("parallel",),        # v7x: shard batch across both TCs
            vmem_limit_bytes=32 << 20,                # a few MiB actually needed
        ),
        cost_estimate=cost,
    )(x, w1, b1, w2, b2, w3, b3, w4, b4)

    return out[:B]


def _kaiming_uniform(key, fan_out, fan_in):
    """PyTorch kaiming_uniform_(nonlinearity='relu'): U(-b, b), b = sqrt(6/fan_in).
    Generated as (out, in) like nn.Linear.weight, then transposed to (in, out)."""
    bound = (6.0 / fan_in) ** 0.5
    w = jax.random.uniform(key, (fan_out, fan_in), jnp.float32, -bound, bound)
    return w.T


def init_params(key):
    # TODO(synk): PyTorch default nn.Linear init differs (a=sqrt(5), uniform bias);
    # the module overrides it with kaiming_uniform(relu) + zero bias, matched here.
    k1, k2, k3, k4 = jax.random.split(key, 4)
    w1 = _kaiming_uniform(k1, HIDDEN_SIZE1, INPUT_SIZE)           # (64, 128)
    w1 = jnp.pad(w1, ((0, PADDED_INPUT - INPUT_SIZE), (0, 0)))    # zero-pad K -> (128, 128)
    return {
        "w1": w1.astype(jnp.bfloat16),
        "b1": jnp.zeros((1, HIDDEN_SIZE1), jnp.float32),
        "w2": _kaiming_uniform(k2, HIDDEN_SIZE2, HIDDEN_SIZE1).astype(jnp.bfloat16),
        "b2": jnp.zeros((1, HIDDEN_SIZE2), jnp.float32),
        "w3": _kaiming_uniform(k3, HIDDEN_SIZE1, HIDDEN_SIZE2).astype(jnp.bfloat16),
        "b3": jnp.zeros((1, HIDDEN_SIZE1), jnp.float32),
        "w4": _kaiming_uniform(k4, OUTPUT_SIZE, HIDDEN_SIZE1).astype(jnp.bfloat16),
        "b4": jnp.zeros((1, OUTPUT_SIZE), jnp.float32),
    }


def _reference_forward(x, params):
    """Pure-JAX reference with the same bf16 weight/activation policy."""
    xb = jnp.pad(x, ((0, 0), (0, PADDED_INPUT - x.shape[1]))).astype(jnp.bfloat16)
    h = jnp.maximum(jnp.dot(xb, params["w1"], preferred_element_type=jnp.float32)
                    + params["b1"], 0.0).astype(jnp.bfloat16)
    h = jnp.maximum(jnp.dot(h, params["w2"], preferred_element_type=jnp.float32)
                    + params["b2"], 0.0).astype(jnp.bfloat16)
    h = jnp.maximum(jnp.dot(h, params["w3"], preferred_element_type=jnp.float32)
                    + params["b3"], 0.0).astype(jnp.bfloat16)
    logits = jnp.dot(h, params["w4"], preferred_element_type=jnp.float32) + params["b4"]
    return jax.nn.softmax(logits, axis=-1)


if __name__ == "__main__":
    key = jax.random.PRNGKey(0)
    pkey, xkey = jax.random.split(key)

    params = init_params(pkey)

    B = 8
    x = jax.random.normal(xkey, (B, INPUT_SIZE), jnp.float32)

    out = policy_network_forward(x, params)
    out = jax.block_until_ready(out)

    assert out.shape == (B, OUTPUT_SIZE)

    # softmax rows sum to ~1 (approx reciprocal -> loose tolerance)
    row_sums = jnp.sum(out, axis=-1)
    assert bool(jnp.all(jnp.abs(row_sums - 1.0) < 2e-2)), row_sums

    # matches a pure-JAX reference using the same bf16 policy
    ref = _reference_forward(x, params)
    assert bool(jnp.allclose(out, ref, rtol=5e-2, atol=1e-5))

    print("KERNEL_OK")
</pallas_src>

<mosaic_0001>
module attributes {stable_mosaic.version = 11 : i64} {
  func.func @_policy_kernel(%arg0: i32, %arg1: memref<8x128xbf16, #tpu.memory_space<vmem>>, %arg2: memref<128x128xbf16, #tpu.memory_space<vmem>>, %arg3: memref<1x128xf32, #tpu.memory_space<vmem>>, %arg4: memref<128x256xbf16, #tpu.memory_space<vmem>>, %arg5: memref<1x256xf32, #tpu.memory_space<vmem>>, %arg6: memref<256x128xbf16, #tpu.memory_space<vmem>>, %arg7: memref<1x128xf32, #tpu.memory_space<vmem>>, %arg8: memref<128x4096xbf16, #tpu.memory_space<vmem>>, %arg9: memref<1x4096xf32, #tpu.memory_space<vmem>>, %arg10: memref<8x4096xf32, #tpu.memory_space<vmem>>) attributes {dimension_semantics = [#tpu.dimension_semantics<parallel>], iteration_bounds = array<i64: 1>, scalar_prefetch = 0 : i64, scratch_operands = 0 : i64, tpu.core_type = #tpu.core_type<tc>, window_params = [{transform_indices = @transform_0, window_bounds = array<i64: 8, 128>}, {pipeline_mode = #tpu.pipeline_mode<synchronous>, transform_indices = @transform_1, window_bounds = array<i64: 128, 128>}, {pipeline_mode = #tpu.pipeline_mode<synchronous>, transform_indices = @transform_2, window_bounds = array<i64: 1, 128>}, {pipeline_mode = #tpu.pipeline_mode<synchronous>, transform_indices = @transform_3, window_bounds = array<i64: 128, 256>}, {pipeline_mode = #tpu.pipeline_mode<synchronous>, transform_indices = @transform_4, window_bounds = array<i64: 1, 256>}, {pipeline_mode = #tpu.pipeline_mode<synchronous>, transform_indices = @transform_5, window_bounds = array<i64: 256, 128>}, {pipeline_mode = #tpu.pipeline_mode<synchronous>, transform_indices = @transform_6, window_bounds = array<i64: 1, 128>}, {pipeline_mode = #tpu.pipeline_mode<synchronous>, transform_indices = @transform_7, window_bounds = array<i64: 128, 4096>}, {pipeline_mode = #tpu.pipeline_mode<synchronous>, transform_indices = @transform_8, window_bounds = array<i64: 1, 4096>}, {transform_indices = @transform_9, window_bounds = array<i64: 8, 4096>}]} {
    %c0 = arith.constant 0 : index
    %c0_0 = arith.constant 0 : index
    %0 = vector.load %arg1[%c0, %c0_0] : memref<8x128xbf16, #tpu.memory_space<vmem>>, vector<8x128xbf16>
    %c0_1 = arith.constant 0 : index
    %c0_2 = arith.constant 0 : index
    %1 = vector.load %arg2[%c0_1, %c0_2] : memref<128x128xbf16, #tpu.memory_space<vmem>>, vector<128x128xbf16>
    %cst = arith.constant dense<0.000000e+00> : vector<8x128xf32>
    %2 = tpu.matmul %0, %1, %cst {dimension_numbers = #tpu.dot_dimension_numbers<[1], [0], [0], [1], [0, 0, 1, 1], [], []>} : vector<8x128xbf16>, vector<128x128xbf16>, vector<8x128xf32> -> vector<8x128xf32>
    %c0_3 = arith.constant 0 : index
    %c0_4 = arith.constant 0 : index
    %3 = vector.load %arg3[%c0_3, %c0_4] : memref<1x128xf32, #tpu.memory_space<vmem>>, vector<1x128xf32>
    %4 = vector.broadcast %3 : vector<1x128xf32> to vector<8x128xf32>
    %5 = arith.addf %2, %4 : vector<8x128xf32>
    %cst_5 = arith.constant 0.000000e+00 : f32
    %6 = vector.broadcast %cst_5 : f32 to vector<8x128xf32>
    %7 = arith.maximumf %5, %6 : vector<8x128xf32>
    %8 = arith.truncf %7 : vector<8x128xf32> to vector<8x128xbf16>
    %c0_6 = arith.constant 0 : index
    %c0_7 = arith.constant 0 : index
    %9 = vector.load %arg4[%c0_6, %c0_7] : memref<128x256xbf16, #tpu.memory_space<vmem>>, vector<128x256xbf16>
    %cst_8 = arith.constant dense<0.000000e+00> : vector<8x256xf32>
    %10 = tpu.matmul %8, %9, %cst_8 {dimension_numbers = #tpu.dot_dimension_numbers<[1], [0], [0], [1], [0, 0, 1, 1], [], []>} : vector<8x128xbf16>, vector<128x256xbf16>, vector<8x256xf32> -> vector<8x256xf32>
    %c0_9 = arith.constant 0 : index
    %c0_10 = arith.constant 0 : index
    %11 = vector.load %arg5[%c0_9, %c0_10] : memref<1x256xf32, #tpu.memory_space<vmem>>, vector<1x256xf32>
    %12 = vector.broadcast %11 : vector<1x256xf32> to vector<8x256xf32>
    %13 = arith.addf %10, %12 : vector<8x256xf32>
    %cst_11 = arith.constant 0.000000e+00 : f32
    %14 = vector.broadcast %cst_11 : f32 to vector<8x256xf32>
    %15 = arith.maximumf %13, %14 : vector<8x256xf32>
    %16 = arith.truncf %15 : vector<8x256xf32> to vector<8x256xbf16>
    %c0_12 = arith.constant 0 : index
    %c0_13 = arith.constant 0 : index
    %17 = vector.load %arg6[%c0_12, %c0_13] : memref<256x128xbf16, #tpu.memory_space<vmem>>, vector<256x128xbf16>
    %cst_14 = arith.constant dense<0.000000e+00> : vector<8x128xf32>
    %18 = tpu.matmul %16, %17, %cst_14 {dimension_numbers = #tpu.dot_dimension_numbers<[1], [0], [0], [1], [0, 0, 1, 1], [], []>} : vector<8x256xbf16>, vector<256x128xbf16>, vector<8x128xf32> -> vector<8x128xf32>
    %c0_15 = arith.constant 0 : index
    %c0_16 = arith.constant 0 : index
    %19 = vector.load %arg7[%c0_15, %c0_16] : memref<1x128xf32, #tpu.memory_space<vmem>>, vector<1x128xf32>
    %20 = vector.broadcast %19 : vector<1x128xf32> to vector<8x128xf32>
    %21 = arith.addf %18, %20 : vector<8x128xf32>
    %cst_17 = arith.constant 0.000000e+00 : f32
    %22 = vector.broadcast %cst_17 : f32 to vector<8x128xf32>
    %23 = arith.maximumf %21, %22 : vector<8x128xf32>
    %24 = arith.truncf %23 : vector<8x128xf32> to vector<8x128xbf16>
    %c0_18 = arith.constant 0 : index
    %c0_19 = arith.constant 0 : index
    %25 = vector.load %arg8[%c0_18, %c0_19] : memref<128x4096xbf16, #tpu.memory_space<vmem>>, vector<128x4096xbf16>
    %cst_20 = arith.constant dense<0.000000e+00> : vector<8x4096xf32>
    %26 = tpu.matmul %24, %25, %cst_20 {dimension_numbers = #tpu.dot_dimension_numbers<[1], [0], [0], [1], [0, 0, 1, 1], [], []>} : vector<8x128xbf16>, vector<128x4096xbf16>, vector<8x4096xf32> -> vector<8x4096xf32>
    %c0_21 = arith.constant 0 : index
    %c0_22 = arith.constant 0 : index
    %27 = vector.load %arg9[%c0_21, %c0_22] : memref<1x4096xf32, #tpu.memory_space<vmem>>, vector<1x4096xf32>
    %28 = vector.broadcast %27 : vector<1x4096xf32> to vector<8x4096xf32>
    %29 = arith.addf %26, %28 : vector<8x4096xf32>
    %cst_23 = arith.constant dense<0xFF800000> : vector<8xf32>
    %30 = vector.multi_reduction <maximumf>, %29, %cst_23 [1] : vector<8x4096xf32> to vector<8xf32>
    %31 = vector.shape_cast %30 : vector<8xf32> to vector<8x1xf32>
    %32 = vector.broadcast %31 : vector<8x1xf32> to vector<8x4096xf32>
    %33 = arith.subf %29, %32 : vector<8x4096xf32>
    %34 = math.exp %33 : vector<8x4096xf32>
    %cst_24 = arith.constant dense<0.000000e+00> : vector<8xf32>
    %35 = vector.multi_reduction <add>, %34, %cst_24 [1] : vector<8x4096xf32> to vector<8xf32>
    %36 = vector.shape_cast %35 : vector<8xf32> to vector<8x1xf32>
    %37 = tpu.reciprocal %36 {approx = true} : vector<8x1xf32> -> vector<8x1xf32>
    %38 = vector.broadcast %37 : vector<8x1xf32> to vector<8x4096xf32>
    %39 = arith.mulf %34, %38 : vector<8x4096xf32>
    %c0_25 = arith.constant 0 : index
    %c0_26 = arith.constant 0 : index
    %40 = vector.load %arg10[%c0_25, %c0_26] : memref<8x4096xf32, #tpu.memory_space<vmem>>, vector<8x4096xf32>
    tpu.vector_store %arg10[%c0_25, %c0_26], %39 {strides = array<i32>} : memref<8x4096xf32, #tpu.memory_space<vmem>>, vector<8x4096xf32>,
    return
  }
  func.func @transform_0(%arg0: i32) -> (i32, i32) {
    %c0_i32 = arith.constant 0 : i32
    %c0_i32_0 = arith.constant 0 : i32
    return %arg0, %c0_i32 : i32, i32
  }
  func.func @transform_1(%arg0: i32) -> (i32, i32) {
    %c0_i32 = arith.constant 0 : i32
    %c0_i32_0 = arith.constant 0 : i32
    %c0_i32_1 = arith.constant 0 : i32
    return %c0_i32, %c0_i32_0 : i32, i32
  }
  func.func @transform_2(%arg0: i32) -> (i32, i32) {
    %c0_i32 = arith.constant 0 : i32
    %c0_i32_0 = arith.constant 0 : i32
    %c0_i32_1 = arith.constant 0 : i32
    return %c0_i32, %c0_i32_0 : i32, i32
  }
  func.func @transform_3(%arg0: i32) -> (i32, i32) {
    %c0_i32 = arith.constant 0 : i32
    %c0_i32_0 = arith.constant 0 : i32
    %c0_i32_1 = arith.constant 0 : i32
    return %c0_i32, %c0_i32_0 : i32, i32
  }
  func.func @transform_4(%arg0: i32) -> (i32, i32) {
    %c0_i32 = arith.constant 0 : i32
    %c0_i32_0 = arith.constant 0 : i32
    %c0_i32_1 = arith.constant 0 : i32
    return %c0_i32, %c0_i32_0 : i32, i32
  }
  func.func @transform_5(%arg0: i32) -> (i32, i32) {
    %c0_i32 = arith.constant 0 : i32
    %c0_i32_0 = arith.constant 0 : i32
    %c0_i32_1 = arith.constant 0 : i32
    return %c0_i32, %c0_i32_0 : i32, i32
  }
  func.func @transform_6(%arg0: i32) -> (i32, i32) {
    %c0_i32 = arith.constant 0 : i32
    %c0_i32_0 = arith.constant 0 : i32
    %c0_i32_1 = arith.constant 0 : i32
    return %c0_i32, %c0_i32_0 : i32, i32
  }
  func.func @transform_7(%arg0: i32) -> (i32, i32) {
    %c0_i32 = arith.constant 0 : i32
    %c0_i32_0 = arith.constant 0 : i32
    %c0_i32_1 = arith.constant 0 : i32
    return %c0_i32, %c0_i32_0 : i32, i32
  }
  func.func @transform_8(%arg0: i32) -> (i32, i32) {
    %c0_i32 = arith.constant 0 : i32
    %c0_i32_0 = arith.constant 0 : i32
    %c0_i32_1 = arith.constant 0 : i32
    return %c0_i32, %c0_i32_0 : i32, i32
  }
  func.func @transform_9(%arg0: i32) -> (i32, i32) {
    %c0_i32 = arith.constant 0 : i32
    %c0_i32_0 = arith.constant 0 : i32
    return %arg0, %c0_i32 : i32, i32
  }
}

</mosaic_0001>

<bundles_post_ra>
// kernel: tpu_custom_call.1
= control target key start
LH: loop header
LB: loop body
LE: loop exit
PB: predicated region body
PF: predicated region fallthrough
CT: control target
= control target key end

     0   :  { %14 = vsyncpa [#allocation3], 0  ;;  %s4985_s0 = inlined_call_operand.hbm [shape: bf16[8,128], index: 0, kind: input, shape index: {}]   ;;  %s4986_s1 = inlined_call_operand.hbm [shape: bf16[128,128], index: 1, kind: input, shape index: {}]   ;;  %s4987_s2 = inlined_call_operand.vmem [shape: f32[1,128], index: 2, kind: input, shape index: {}]   ;;  %s4988_s3 = inlined_call_operand.hbm [shape: bf16[128,256], index: 3, kind: input, shape index: {}]   ;;  %s4989_s4 = inlined_call_operand.vmem [shape: f32[1,256], index: 4, kind: input, shape index: {}]   ;;  %s4990_s5 = inlined_call_operand.hbm [shape: bf16[256,128], index: 5, kind: input, shape index: {}]   ;;  %s4991_s6 = inlined_call_operand.vmem [shape: f32[1,128], index: 6, kind: input, shape index: {}]   ;;  %s4992_s7 = inlined_call_operand.hbm [shape: bf16[128,4096], index: 7, kind: input, shape index: {}]   ;;  %s4993_s8 = inlined_call_operand.hbm [shape: f32[1,4096], index: 8, kind: input, shape index: {}]   ;;  %s4994_s9 = inlined_call_operand.hbm [shape: f32[8,4096], index: 9, kind: output, shape index: {}]  }
   0x1   :  { %15 = vsyncpa [#allocation6], 0 }
   0x2   :  { %16 = vsyncpa [#allocation9], 0 }
   0x3   :  { %17 = vsyncpa [#allocation12], 0  ;;  %s34_s11 = sshll.u32 %s4986_s1, 4  ;;  %s35_s11 = int_to_ptr.hbm [resolvable:$true] %s34_s11 }
   0x4   :  { %18 = vsyncpa [#allocation4], 0  ;;  %s4508_s12 = smov [#allocation5]   ;;  %s64_s16 = sshll.u32 %s4990_s5, 4  ;;  %s65_s16 = int_to_ptr.hbm [resolvable:$true] %s64_s16 }
   0x5   :  { %s36_s13 = sshll.u32 %s4508_s12, 4  ;;  %s4509_s17 = smov 64   ;;  %s37_s13 = int_to_ptr.vmem [resolvable:$true] %s36_s13 }
   0x6   :  { %s4510_s18 = smov 4   ;;  %s4511_s19 = smov [#allocation8]  }
   0x7   :  { %42 = dma.hbm_to_vmem [thread:$0]  %s35_s11, 1024, %s37_s13, [#allocation6], %s4509_s17, %s4509_s17, %s4510_s18  }
   0x8   :  { %s66_s20 = sshll.u32 %s4511_s19, 4  ;;  %s24_s23 = sshll.u32 %s4985_s0, 4  ;;  %s67_s20 = int_to_ptr.vmem [resolvable:$true] %s66_s20  ;;  %s25_s23 = int_to_ptr.hbm [resolvable:$true] %s24_s23 }
   0x9   :  { %72 = dma.hbm_to_vmem [thread:$0]  %s65_s16, 2048, %s67_s20, [#allocation9], %s4509_s17, %s4509_s17, %s4510_s18  }
   0xa   :  { %s49_s25 = sshll.u32 %s4988_s3, 4  ;;  %s4512_s26 = smov [#allocation2]   ;;  %s50_s25 = int_to_ptr.hbm [resolvable:$true] %s49_s25 }
   0xb   :  { %s26_s27 = sshll.u32 %s4512_s26, 4  ;;  %s4513_s5 = smov [#allocation7]   ;;  %s27_s27 = int_to_ptr.vmem [resolvable:$true] %s26_s27 }
   0xc   :  { %29 = dma.hbm_to_vmem [thread:$0]  %s25_s23, 64, %s27_s27, [#allocation3]  }
   0xd   :  { %s51_s28 = sshll.u32 %s4513_s5, 4  ;;  %s4514_s29 = smov 128   ;;  %s52_s28 = int_to_ptr.vmem [resolvable:$true] %s51_s28 }
   0xe   :  { %s4515_s30 = smov 8   ;;  %s79_s11 = sshll.u32 %s4992_s7, 4  ;;  %s80_s11 = int_to_ptr.hbm [resolvable:$true] %s79_s11 }
   0xf   :  { %57 = dma.hbm_to_vmem [thread:$0]  %s50_s25, 2048, %s52_s28, [#allocation6], %s4514_s29, %s4514_s29, %s4515_s30  }
  0x10   :  { %s4516_s12 = smov [#allocation10]   ;;  %s4517_s3 = smov 2048  }
  0x11   :  { %s81_s13 = sshll.u32 %s4516_s12, 4  ;;  %s93_s16 = sshll.u32 %s4993_s8, 4  ;;  %s82_s13 = int_to_ptr.vmem [resolvable:$true] %s81_s13  ;;  %s94_s16 = int_to_ptr.hbm [resolvable:$true] %s93_s16 }
  0x12   :  { %87 = dma.hbm_to_vmem [thread:$0]  %s80_s11, 32768, %s82_s13, [#allocation9], %s4517_s3, %s4517_s3, %s4514_s29  }
  0x13   :  { %s4518_s17 = smov [#allocation11]  }
  0x14   :  { %s95_s18 = sshll.u32 %s4518_s17, 4  ;;  %s96_s18 = int_to_ptr.vmem [resolvable:$true] %s95_s18 }
  0x15   :  { %98 = dma.hbm_to_vmem [thread:$0]  %s94_s16, 512, %s96_s18, [#allocation12]  }
  0x16   :  { %4498 = dma.done.wait [#allocation3], 64  }
  0x17   :  { %4499 = vsyncadd [#allocation3], 4294967232 }
  0x18   :  { %4500 = dma.done.wait [#allocation6], 3072  }
  0x19   :  { %4501 = vsyncadd [#allocation6], 4294964224 }
  0x1a   :  { %4502 = dma.done.wait [#allocation9], 34816  }
  0x1b   :  { %4503 = vsyncadd [#allocation9], 4294932480 }
  0x1c   :  { %4504 = dma.done.wait [#allocation12], 512  }
  0x1d   :  { %4505 = vsyncadd [#allocation12], 4294966784  ;;  %v3961_v0 = vld [vmem:[#allocation5 + $0x38] sm:$0xff]  ;;  %v3960_v1 = vld [vmem:[#allocation5 + $0x30] sm:$0xff]  ;;  %s2757_s1 = sshll.u32 %s4994_s9, 4  ;;  %s2758_s1 = int_to_ptr.hbm [resolvable:$true] %s2757_s1 }
  0x1e   :  { %192 = vmatpush.bf16.msra.mxu0 %v3961_v0  ;;  %v2860_v2 = vld [vmem:[#allocation7 + $0x70] sm:$0xf]  ;;  %v3977_v3 = vld [vmem:[#allocation7 + $0x74] sm:$0xf0]  ;;  %v3976_v4 = vld [vmem:[#allocation7 + $0x74] sm:$0xf] }
  0x1f   :  { %v2861_v5 = vor.u32 %v3977_v3, %v2860_v2  ;;  %v2862_v6 = vld [vmem:[#allocation7 + $0x78] sm:$0xf0]  ;;  %v2852_v7 = vld [vmem:[#allocation7 + $0x60] sm:$0xf]  ;;  %v3975_v8 = vld [vmem:[#allocation7 + $0x64] sm:$0xf0] }
  0x20   :  { %v2865_v9 = vor.u32 %v3976_v4, %v2862_v6  ;;  %v3974_v10 = vld [vmem:[#allocation7 + $0x64] sm:$0xf]  ;;  %v2854_v11 = vld [vmem:[#allocation7 + $0x68] sm:$0xf0]  ;;  %v2853_v13 = vor.u32 %v3975_v8, %v2852_v7  ;;  %v2844_v15 = vld [vmem:[#allocation7 + $0x50] sm:$0xf] }
  0x21   :  { %v3959_v12 = vld [vmem:[#allocation5 + $0x28] sm:$0xff]  ;;  %309 = vmatpush.bf16.msra.mxu1 %v2861_v5  ;;  %v2857_v14 = vor.u32 %v3974_v10, %v2854_v11  ;;  %v3973_v16 = vld [vmem:[#allocation7 + $0x54] sm:$0xf0]  ;;  %v3972_v17 = vld [vmem:[#allocation7 + $0x54] sm:$0xf] }
  0x22   :  { %193 = vmatpush.bf16.msra.mxu0 %v3960_v1  ;;  %322 = vmatpush.bf16.msra.mxu2 %v2865_v9  ;;  %v2846_v18 = vld [vmem:[#allocation7 + $0x58] sm:$0xf0]  ;;  %v3958_v19 = vld [vmem:[#allocation5 + $0x20] sm:$0xff]  ;;  %v2845_v20 = vor.u32 %v3973_v16, %v2844_v15  ;;  %v3971_v23 = vld [vmem:[#allocation7 + $0x44] sm:$0xf0] }
  0x23   :  { %v2836_v21 = vld [vmem:[#allocation7 + $0x40] sm:$0xf]  ;;  %v2849_v22 = vor.u32 %v3972_v17, %v2846_v18  ;;  %v3970_v24 = vld [vmem:[#allocation7 + $0x44] sm:$0xf]  ;;  %v2838_v25 = vld [vmem:[#allocation7 + $0x48] sm:$0xf0] }
  0x24   :  { %v3957_v26 = vld [vmem:[#allocation5 + $0x18] sm:$0xff]  ;;  %v2837_v27 = vor.u32 %v3971_v23, %v2836_v21  ;;  %v2841_v28 = vor.u32 %v3970_v24, %v2838_v25  ;;  %v2828_v29 = vld [vmem:[#allocation7 + $0x30] sm:$0xf]  ;;  %v3968_v31 = vld [vmem:[#allocation7 + $0x34] sm:$0xf] }
  0x25   :  { %310 = vmatpush.bf16.msra.mxu1 %v2853_v13  ;;  %v3969_v30 = vld [vmem:[#allocation7 + $0x34] sm:$0xf0]  ;;  %v2830_v32 = vld [vmem:[#allocation7 + $0x38] sm:$0xf0]  ;;  %v3956_v33 = vld [vmem:[#allocation5 + $0x10] sm:$0xff] }
  0x26   :  { %194 = vmatpush.bf16.msra.mxu0 %v3959_v12  ;;  %323 = vmatpush.bf16.msra.mxu2 %v2857_v14  ;;  %v2829_v34 = vor.u32 %v3969_v30, %v2828_v29  ;;  %v2833_v35 = vor.u32 %v3968_v31, %v2830_v32  ;;  %v2820_v36 = vld [vmem:[#allocation7 + $0x20] sm:$0xf]  ;;  %v3967_v37 = vld [vmem:[#allocation7 + $0x24] sm:$0xf0]  ;;  %v3966_v38 = vld [vmem:[#allocation7 + $0x24] sm:$0xf] }
  0x27   :  { %v2822_v39 = vld [vmem:[#allocation7 + $0x28] sm:$0xf0]  ;;  %v2821_v41 = vor.u32 %v3967_v37, %v2820_v36  ;;  %v3954_v43 = vld [vmem:[#allocation5] sm:$0xff]  ;;  %v123_v44 = vld [vmem:[#allocation2] sm:$0xf] }
  0x28   :  { %v3955_v40 = vld [vmem:[#allocation5 + $0x8] sm:$0xff]  ;;  %v2825_v42 = vor.u32 %v3966_v38, %v2822_v39  ;;  %v2812_v45 = vld [vmem:[#allocation7 + $0x10] sm:$0xf]  ;;  %v3965_v46 = vld [vmem:[#allocation7 + $0x14] sm:$0xf0] }
  0x29   :  { %311 = vmatpush.bf16.msra.mxu1 %v2845_v20  ;;  %v3964_v47 = vld [vmem:[#allocation7 + $0x14] sm:$0xf]  ;;  %v2813_v48 = vor.u32 %v3965_v46, %v2812_v45  ;;  %v2814_v49 = vld [vmem:[#allocation7 + $0x18] sm:$0xf0]  ;;  %v2804_v51 = vld [vmem:[#allocation7] sm:$0xf] }
  0x2a   :  { %195 = vmatpush.bf16.msra.mxu0 %v3958_v19  ;;  %324 = vmatpush.bf16.msra.mxu2 %v2849_v22  ;;  %v2817_v50 = vor.u32 %v3964_v47, %v2814_v49  ;;  %v3963_v52 = vld [vmem:[#allocation7 + $0x4] sm:$0xf0]  ;;  %v3962_v53 = vld [vmem:[#allocation7 + $0x4] sm:$0xf]  ;;  %v2806_v55 = vld [vmem:[#allocation7 + $0x8] sm:$0xf0] }
  0x2b   :  { %v2805_v54 = vor.u32 %v3963_v52, %v2804_v51  ;;  %v2809_v56 = vor.u32 %v3962_v53, %v2806_v55  ;;  %v3985_v57 = vld [vmem:[#allocation8 + $0x38] sm:$0xff]  ;;  %v3984_v59 = vld [vmem:[#allocation8 + $0x30] sm:$0xff]  ;;  %v3983_v61 = vld [vmem:[#allocation8 + $0x28] sm:$0xff] }
  0x2c   :  { %v3993_v58 = vld [vmem:[#allocation8 + $0x78] sm:$0xff]  ;;  %471 = vmatpush.bf16.msra.mxu3 %v3985_v57  ;;  %v3992_v60 = vld [vmem:[#allocation8 + $0x70] sm:$0xff]  ;;  %v3991_v62 = vld [vmem:[#allocation8 + $0x68] sm:$0xff] }
  0x2d   :  { %312 = vmatpush.bf16.msra.mxu1 %v2837_v27  ;;  %v3982_v63 = vld [vmem:[#allocation8 + $0x20] sm:$0xff]  ;;  %v3981_v1 = vld [vmem:[#allocation8 + $0x18] sm:$0xff]  ;;  %v3980_v3 = vld [vmem:[#allocation8 + $0x10] sm:$0xff] }
  0x2e   :  { %196 = vmatpush.bf16.msra.mxu0 %v3957_v26  ;;  %325 = vmatpush.bf16.msra.mxu2 %v2841_v28  ;;  %v3990_v0 = vld [vmem:[#allocation8 + $0x60] sm:$0xff]  ;;  %v3989_v2 = vld [vmem:[#allocation8 + $0x58] sm:$0xff]  ;;  %v3979_v10 = vld [vmem:[#allocation8 + $0x8] sm:$0xff] }
  0x2f   :  { %v4262_v4 = vld [vmem:[%s4987_s2] ss:$0 sm:$0xff]  ;;  %v3988_v11 = vld [vmem:[#allocation8 + $0x50] sm:$0xff]  ;;  %v3978_v12 = vld [vmem:[#allocation8] sm:$0xff] }
  0x30   :  { %472 = vmatpush.bf16.msra.mxu3 %v3984_v59  ;;  %v3987_v13 = vld [vmem:[#allocation8 + $0x48] sm:$0xff]  ;;  %v3986_v14 = vld [vmem:[#allocation8 + $0x40] sm:$0xff]  ;;  %v4594_v59 = vld [vmem:[%s4989_s4] sm:$0x3] }
  0x31   :  { %313 = vmatpush.bf16.msra.mxu1 %v2829_v34  ;;  %v3828_v15 = vld [vmem:[#allocation10 + $0x700] sm:$0xf]  ;;  %v4218_v17 = vld [vmem:[#allocation10 + $0x704] sm:$0xf]  ;;  %v3836_v20 = vld [vmem:[#allocation10 + $0x708] sm:$0xf] }
  0x32   :  { %197 = vmatpush.bf16.msra.mxu0 %v3956_v33  ;;  %326 = vmatpush.bf16.msra.mxu2 %v2833_v35  ;;  %v4234_v16 = vld [vmem:[#allocation10 + $0x77c] sm:$0xf0]  ;;  %v3830_v19 = vld [vmem:[#allocation10 + $0x780] sm:$0xf0]  ;;  %v4235_v21 = vld [vmem:[#allocation10 + $0x784] sm:$0xf0] }
  0x33   :  { %v3829_v18 = vor.u32 %v4234_v16, %v3828_v15  ;;  %v3833_v22 = vor.u32 %v4218_v17, %v3830_v19  ;;  %v3837_v23 = vor.u32 %v4235_v21, %v3836_v20  ;;  %v4219_v24 = vld [vmem:[#allocation10 + $0x70c] sm:$0xf]  ;;  %v3700_v26 = vld [vmem:[#allocation10 + $0x600] sm:$0xf]  ;;  %v4186_v29 = vld [vmem:[#allocation10 + $0x604] sm:$0xf] }
  0x34   :  { %473 = vmatpush.bf16.msra.mxu3 %v3983_v61  ;;  %v3838_v25 = vld [vmem:[#allocation10 + $0x788] sm:$0xf0]  ;;  %v4202_v28 = vld [vmem:[#allocation10 + $0x67c] sm:$0xf0]  ;;  %v3702_v30 = vld [vmem:[#allocation10 + $0x680] sm:$0xf0] }
  0x35   :  { %314 = vmatpush.bf16.msra.mxu1 %v2821_v41  ;;  %v3841_v27 = vor.u32 %v4219_v24, %v3838_v25  ;;  %v3701_v31 = vor.u32 %v4202_v28, %v3700_v26  ;;  %v3705_v32 = vor.u32 %v4186_v29, %v3702_v30  ;;  %v3708_v33 = vld [vmem:[#allocation10 + $0x608] sm:$0xf]  ;;  %v4187_v35 = vld [vmem:[#allocation10 + $0x60c] sm:$0xf]  ;;  %v3572_v38 = vld [vmem:[#allocation10 + $0x500] sm:$0xf] }
  0x36   :  { %198 = vmatpush.bf16.msra.mxu0 %v3955_v40  ;;  %327 = vmatpush.bf16.msra.mxu2 %v2825_v42  ;;  %v4203_v34 = vld [vmem:[#allocation10 + $0x684] sm:$0xf0]  ;;  %v3710_v37 = vld [vmem:[#allocation10 + $0x688] sm:$0xf0]  ;;  %v4170_v39 = vld [vmem:[#allocation10 + $0x57c] sm:$0xf0] }
  0x37   :  { %v3709_v36 = vor.u32 %v4203_v34, %v3708_v33  ;;  %v3713_v40 = vor.u32 %v4187_v35, %v3710_v37  ;;  %v4154_v41 = vld [vmem:[#allocation10 + $0x504] sm:$0xf]  ;;  %v4171_v45 = vld [vmem:[#allocation10 + $0x584] sm:$0xf0]  ;;  %v4155_v46 = vld [vmem:[#allocation10 + $0x50c] sm:$0xf] }
  0x38   :  { %474 = vmatpush.bf16.msra.mxu3 %v3982_v63  ;;  %v3574_v42 = vld [vmem:[#allocation10 + $0x580] sm:$0xf0]  ;;  %v3582_v47 = vld [vmem:[#allocation10 + $0x588] sm:$0xf0]  ;;  %v4138_v51 = vld [vmem:[#allocation10 + $0x47c] sm:$0xf0] }
  0x39   :  { %315 = vmatpush.bf16.msra.mxu1 %v2813_v48  ;;  %v3577_v48 = vor.u32 %v4154_v41, %v3574_v42  ;;  %v4122_v52 = vld [vmem:[#allocation10 + $0x404] sm:$0xf]  ;;  %v3585_v53 = vor.u32 %v4155_v46, %v3582_v47  ;;  %v3452_v55 = vld [vmem:[#allocation10 + $0x408] sm:$0xf]  ;;  %v4123_v57 = vld [vmem:[#allocation10 + $0x40c] sm:$0xf] }
  0x3a   :  { %199 = vmatpush.bf16.msra.mxu0 %v3954_v43  ;;  %328 = vmatpush.bf16.msra.mxu2 %v2817_v50  ;;  %v3580_v43 = vld [vmem:[#allocation10 + $0x508] sm:$0xf]  ;;  %v3444_v50 = vld [vmem:[#allocation10 + $0x400] sm:$0xf]  ;;  %v3190_v16 = vld [vmem:[#allocation10 + $0x280] sm:$0xf0] }
  0x3b   :  { %v3581_v49 = vor.u32 %v4171_v45, %v3580_v43  ;;  %v3316_v63 = vld [vmem:[#allocation10 + $0x300] sm:$0xf]  ;;  %v3196_v17 = vld [vmem:[#allocation10 + $0x208] sm:$0xf]  ;;  %v4059_v20 = vld [vmem:[#allocation10 + $0x20c] sm:$0xf] }
  0x3c   :  { %475 = vmatpush.bf16.msra.mxu3 %v3981_v1  ;;  %v4090_v1 = vld [vmem:[#allocation10 + $0x304] sm:$0xf]  ;;  %v3198_v21 = vld [vmem:[#allocation10 + $0x288] sm:$0xf0]  ;;  %v3060_v24 = vld [vmem:[#allocation10 + $0x100] sm:$0xf] }
  0x3d   :  { %200 = vmatmul.bf16.vlgmr.msra.gmra.mxu0 %v123_v44  ;;  %316 = vmatpush.bf16.msra.mxu1 %v2805_v54  ;;  %v3573_v44 = vor.u32 %v4170_v39, %v3572_v38  ;;  %v3446_v54 = vld [vmem:[#allocation10 + $0x480] sm:$0xf0]  ;;  %v3068_v33 = vld [vmem:[#allocation10 + $0x108] sm:$0xf]  ;;  %v4027_v35 = vld [vmem:[#allocation10 + $0x10c] sm:$0xf] }
  0x3e   :  { %329 = vmatpush.bf16.msra.mxu2 %v2809_v56  ;;  %484 = vmatpush.bf16.msrb.mxu0 %v3993_v58  ;;  %v4139_v56 = vld [vmem:[#allocation10 + $0x484] sm:$0xf0]  ;;  %v3454_v58 = vld [vmem:[#allocation10 + $0x488] sm:$0xf0]  ;;  %v3449_v61 = vor.u32 %v4122_v52, %v3446_v54  ;;  %v4026_v28 = vld [vmem:[#allocation10 + $0x104] sm:$0xf] }
  0x3f   :  { %v3062_v29 = vld [vmem:[#allocation10 + $0x180] sm:$0xf0]  ;;  %v4043_v34 = vld [vmem:[#allocation10 + $0x184] sm:$0xf0]  ;;  %v2932_v39 = vld [vmem:[#allocation10] sm:$0xf] }
  0x40   :  { %476 = vmatpush.bf16.msra.mxu3 %v3980_v3  ;;  %v3318_v3 = vld [vmem:[#allocation10 + $0x380] sm:$0xf0]  ;;  %v3065_v43 = vor.u32 %v4026_v28, %v3062_v29  ;;  %v2940_v46 = vld [vmem:[#allocation10 + $0x8] sm:$0xf]  ;;  %v3844_v52 = vld [vmem:[#allocation10 + $0x710] sm:$0xf] }
  0x41   :  { %2107 = vmatpush.bf16.msrb.mxu1 %v3829_v18  ;;  %v4075_v18 = vld [vmem:[#allocation10 + $0x284] sm:$0xf0]  ;;  %v3994_v41 = vld [vmem:[#allocation10 + $0x4] sm:$0xf]  ;;  %v4236_v54 = vld [vmem:[#allocation10 + $0x78c] sm:$0xf0] }
  0x42   :  { %485 = vmatpush.bf16.msrb.mxu0 %v3992_v60  ;;  %2120 = vmatpush.bf16.msrb.mxu2 %v3833_v22  ;;  %v3445_v60 = vor.u32 %v4138_v51, %v3444_v50  ;;  %v3197_v26 = vor.u32 %v4075_v18, %v3196_v17  ;;  %v2934_v45 = vld [vmem:[#allocation10 + $0x80] sm:$0xf0]  ;;  %v4011_v47 = vld [vmem:[#allocation10 + $0x84] sm:$0xf0]  ;;  %v3995_v50 = vld [vmem:[#allocation10 + $0xc] sm:$0xf] }
  0x43   :  { %v2942_v51 = vld [vmem:[#allocation10 + $0x88] sm:$0xf0] }
  0x44   :  { %477 = vmatpush.bf16.msra.mxu3 %v3979_v10  ;;  %v3321_v10 = vor.u32 %v4090_v1, %v3318_v3  ;;  %v3845_v3 = vor.u32 %v4236_v54, %v3844_v52 }
  0x45   :  { %2108 = vmatpush.bf16.msrb.mxu1 %v3701_v31  ;;  %v226_v31 = vperm.slane %v4594_v59, 1 }
  0x46   :  { %486 = vmatpush.bf16.msrb.mxu0 %v3991_v62  ;;  %2121 = vmatpush.bf16.msrb.mxu2 %v3705_v32  ;;  %v3453_v62 = vor.u32 %v4139_v56, %v3452_v55  ;;  %v3201_v32 = vor.u32 %v4059_v20, %v3198_v21  ;;  %v4220_v55 = vld [vmem:[#allocation10 + $0x714] sm:$0xf]  ;;  %v4172_v20 = vld [vmem:[#allocation10 + $0x58c] sm:$0xf0] }
  0x47   :  { %v3846_v56 = vld [vmem:[#allocation10 + $0x790] sm:$0xf0] }
  0x48   :  { %478 = vmatpush.bf16.msra.mxu3 %v3978_v12  ;;  %v3188_v12 = vld [vmem:[#allocation10 + $0x200] sm:$0xf]  ;;  %v4156_v21 = vld [vmem:[#allocation10 + $0x514] sm:$0xf] }
  0x49   :  { %2109 = vmatpush.bf16.msrb.mxu1 %v3573_v44  ;;  %v3069_v44 = vor.u32 %v4043_v34, %v3068_v33  ;;  %v4124_v33 = vld [vmem:[#allocation10 + $0x414] sm:$0xf] }
  0x4a   :  { %487 = vmatpush.bf16.msrb.mxu0 %v3990_v0  ;;  %2122 = vmatpush.bf16.msrb.mxu2 %v3577_v48  ;;  %v4106_v0 = vld [vmem:[#allocation10 + $0x37c] sm:$0xf0] }
  0x4c   :  { %2133 = vmatpush.bf16.msrb.mxu3 %v3837_v23 }
  0x4d   :  { %2110 = vmatpush.bf16.msrb.mxu1 %v3445_v60  ;;  %v4237_v60 = vld [vmem:[#allocation10 + $0x794] sm:$0xf0] }
  0x4e   :  { %488 = vmatpush.bf16.msrb.mxu0 %v3989_v2  ;;  %v3457_v2 = vor.u32 %v4123_v57, %v3454_v58  ;;  %2123 = vmatpush.bf16.msrb.mxu2 %v3449_v61  ;;  %v2937_v61 = vor.u32 %v3994_v41, %v2934_v45  ;;  %v4092_v45 = vld [vmem:[#allocation10 + $0x314] sm:$0xf] }
  0x50   :  { %2134 = vmatpush.bf16.msrb.mxu3 %v3709_v36  ;;  %v3070_v36 = vld [vmem:[#allocation10 + $0x188] sm:$0xf0] }
  0x52   :  { %489 = vmatpush.bf16.msrb.mxu0 %v3988_v11  ;;  %2124 = vmatpush.bf16.msrb.mxu2 %v3321_v10  ;;  %v3718_v10 = vld [vmem:[#allocation10 + $0x690] sm:$0xf0] }
  0x54   :  { %2135 = vmatpush.bf16.msrb.mxu3 %v3581_v49  ;;  %v3073_v49 = vor.u32 %v4027_v35, %v3070_v36  ;;  %v3462_v35 = vld [vmem:[#allocation10 + $0x490] sm:$0xf0]  ;;  %v3468_v36 = vld [vmem:[#allocation10 + $0x418] sm:$0xf] }
  0x55   :  { %v3465_v41 = vor.u32 %v4124_v33, %v3462_v35  ;;  %v3860_v33 = vld [vmem:[#allocation10 + $0x720] sm:$0xf]  ;;  %v4222_v35 = vld [vmem:[#allocation10 + $0x724] sm:$0xf] }
  0x56   :  { %490 = vmatpush.bf16.msrb.mxu0 %v3987_v13  ;;  %v4074_v13 = vld [vmem:[#allocation10 + $0x27c] sm:$0xf0] }
  0x57   :  { %v3189_v23 = vor.u32 %v4074_v13, %v3188_v12  ;;  %v4205_v12 = vld [vmem:[#allocation10 + $0x694] sm:$0xf0] }
  0x58   :  { %2136 = vmatpush.bf16.msrb.mxu3 %v3453_v62  ;;  %v2941_v62 = vor.u32 %v4011_v47, %v2940_v46  ;;  %v3334_v47 = vld [vmem:[#allocation10 + $0x390] sm:$0xf0] }
  0x5a   :  { %491 = vmatpush.bf16.msrb.mxu0 %v3986_v14  ;;  %v4058_v14 = vld [vmem:[#allocation10 + $0x204] sm:$0xf] }
  0x5b   :  { %v3193_v25 = vor.u32 %v4058_v14, %v3190_v16  ;;  %v4189_v14 = vld [vmem:[#allocation10 + $0x61c] sm:$0xf] }
  0x5d   :  { %2125 = vmatpush.bf16.msrb.mxu2 %v3193_v25  ;;  %v4173_v25 = vld [vmem:[#allocation10 + $0x594] sm:$0xf0] }
  0x5e   :  { %2146 = vmatpush.bf16.msra.mxu0 %v3841_v27  ;;  %v4042_v27 = vld [vmem:[#allocation10 + $0x17c] sm:$0xf0] }
  0x5f   :  { %v3061_v38 = vor.u32 %v4042_v27, %v3060_v24  ;;  %v3596_v24 = vld [vmem:[#allocation10 + $0x518] sm:$0xf]  ;;  %v3598_v27 = vld [vmem:[#allocation10 + $0x598] sm:$0xf0] }
  0x61   :  { %2126 = vmatpush.bf16.msrb.mxu2 %v3065_v43  ;;  %v3332_v43 = vld [vmem:[#allocation10 + $0x310] sm:$0xf] }
  0x62   :  { %2147 = vmatpush.bf16.msra.mxu0 %v3713_v40  ;;  %v4010_v40 = vld [vmem:[#allocation10 + $0x7c] sm:$0xf0] }
  0x63   :  { %v2933_v58 = vor.u32 %v4010_v40, %v2932_v39  ;;  %v3470_v39 = vld [vmem:[#allocation10 + $0x498] sm:$0xf0] }
  0x65   :  { %2127 = vmatpush.bf16.msrb.mxu2 %v2937_v61  ;;  %v3212_v61 = vld [vmem:[#allocation10 + $0x218] sm:$0xf] }
  0x66   :  { %2148 = vmatpush.bf16.msra.mxu0 %v3585_v53 }
  0x6a   :  { %2149 = vmatpush.bf16.msra.mxu0 %v3457_v2  ;;  %v2945_v2 = vor.u32 %v3995_v50, %v2942_v51  ;;  %v4093_v50 = vld [vmem:[#allocation10 + $0x31c] sm:$0xf] }
  0x6b   :  { %v3342_v51 = vld [vmem:[#allocation10 + $0x398] sm:$0xf0] }
  0xba   :  { %v201_v5 = vpop.f32.mrf.mxu0 }
  0xbb   :  { %v202_v6 = vadd.f32 %v4262_v4, %v201_v5  ;;  %v3324_v4 = vld [vmem:[#allocation10 + $0x308] sm:$0xf] }
  0xbc   :  { %v4107_v5 = vld [vmem:[#allocation10 + $0x384] sm:$0xf0] }
  0xbd   :  { %v205_v7 = vmax.f32 %v202_v6, 0.0  ;;  %v4091_v6 = vld [vmem:[#allocation10 + $0x30c] sm:$0xf]  ;;  %v3325_v11 = vor.u32 %v4107_v5, %v3324_v4  ;;  %v3849_v4 = vor.u32 %v4220_v55, %v3846_v56  ;;  %v3345_v55 = vor.u32 %v4093_v50, %v3342_v51  ;;  %v3204_v56 = vld [vmem:[#allocation10 + $0x210] sm:$0xf] }
  0xbe   :  { %v4190_v51 = vld [vmem:[#allocation10 + $0x624] sm:$0xf] }
  0xbf   :  { %v206_v8 = vpack.c.bf16 %v205_v7, %v205_v7  ;;  %v3326_v7 = vld [vmem:[#allocation10 + $0x388] sm:$0xf0]  ;;  %2137 = vmatpush.bf16.msrb.mxu3 %v3325_v11  ;;  %v3724_v11 = vld [vmem:[#allocation10 + $0x618] sm:$0xf] }
  0xc0   :  { %v3329_v15 = vor.u32 %v4091_v6, %v3326_v7  ;;  %v3716_v6 = vld [vmem:[#allocation10 + $0x610] sm:$0xf]  ;;  %v3725_v18 = vor.u32 %v4205_v12, %v3724_v11 }
  0xc1   :  { %317 = vmatmul.bf16.vlgmr.msra.gmra.mxu1 %v206_v8  ;;  %330 = vmatmul.bf16.vlgmr.msra.gmra.mxu2 %v206_v8  ;;  %v225_v8 = vperm.slane %v4594_v59, 0  ;;  %v3852_v59 = vld [vmem:[#allocation10 + $0x718] sm:$0xf]  ;;  %v4204_v7 = vld [vmem:[#allocation10 + $0x68c] sm:$0xf0] }
  0xc2   :  { %v203_v9 = vpop.f32.mrf.mxu0  ;;  %2150 = vmatpush.bf16.msra.mxu0 %v3329_v15  ;;  %v3853_v5 = vor.u32 %v4237_v60, %v3852_v59  ;;  %v3726_v15 = vld [vmem:[#allocation10 + $0x698] sm:$0xf0]  ;;  %v3717_v16 = vor.u32 %v4204_v7, %v3716_v6  ;;  %2172 = vmatpush.bf16.msra.mxu2 %v3849_v4  ;;  %v3206_v60 = vld [vmem:[#allocation10 + $0x290] sm:$0xf0]  ;;  %v3076_v4 = vld [vmem:[#allocation10 + $0x110] sm:$0xf] }
  0xc3   :  { %v3317_v9 = vor.u32 %v4106_v0, %v3316_v63  ;;  %2138 = vmatpush.bf16.msrb.mxu3 %v3197_v26  ;;  %v4221_v63 = vld [vmem:[#allocation10 + $0x71c] sm:$0xf]  ;;  %v4028_v6 = vld [vmem:[#allocation10 + $0x114] sm:$0xf] }
  0xc4   :  { %v3854_v0 = vld [vmem:[#allocation10 + $0x798] sm:$0xf0] }
  0xc5   :  { %2111 = vmatpush.bf16.msrb.mxu1 %v3317_v9  ;;  %v3857_v9 = vor.u32 %v4221_v63, %v3854_v0  ;;  %v4157_v26 = vld [vmem:[#allocation10 + $0x51c] sm:$0xf] }
  0xc6   :  { %2151 = vmatpush.bf16.msra.mxu0 %v3201_v32  ;;  %v4140_v32 = vld [vmem:[#allocation10 + $0x48c] sm:$0xf0]  ;;  %v3601_v34 = vor.u32 %v4157_v26, %v3598_v27  ;;  %v2958_v26 = vld [vmem:[#allocation10 + $0x98] sm:$0xf0] }
  0xc7   :  { %2139 = vmatpush.bf16.msrb.mxu3 %v3069_v44  ;;  %v4108_v44 = vld [vmem:[#allocation10 + $0x38c] sm:$0xf0] }
  0xc8   :  { %v3333_v52 = vor.u32 %v4108_v44, %v3332_v43 }
  0xc9   :  { %2112 = vmatpush.bf16.msrb.mxu1 %v3189_v23  ;;  %v3590_v23 = vld [vmem:[#allocation10 + $0x590] sm:$0xf0] }
  0xca   :  { %2152 = vmatpush.bf16.msra.mxu0 %v3073_v49  ;;  %v3593_v29 = vor.u32 %v4156_v21, %v3590_v23  ;;  %v4109_v49 = vld [vmem:[#allocation10 + $0x394] sm:$0xf0] }
  0xcb   :  { %2140 = vmatpush.bf16.msrb.mxu3 %v2941_v62  ;;  %v4077_v62 = vld [vmem:[#allocation10 + $0x294] sm:$0xf0] }
  0xcc   :  { %v3213_v0 = vor.u32 %v4077_v62, %v3212_v61  ;;  %v2956_v21 = vld [vmem:[#allocation10 + $0x18] sm:$0xf] }
  0xcd   :  { %2113 = vmatpush.bf16.msrb.mxu1 %v3061_v38  ;;  %v4125_v38 = vld [vmem:[#allocation10 + $0x41c] sm:$0xf] }
  0xce   :  { %2153 = vmatpush.bf16.msra.mxu0 %v2945_v2  ;;  %v3473_v46 = vor.u32 %v4125_v38, %v3470_v39  ;;  %v3214_v2 = vld [vmem:[#allocation10 + $0x298] sm:$0xf0]  ;;  %v4239_v38 = vld [vmem:[#allocation10 + $0x7a4] sm:$0xf0] }
  0xd1   :  { %2114 = vmatpush.bf16.msrb.mxu1 %v2933_v58  ;;  %v4060_v58 = vld [vmem:[#allocation10 + $0x214] sm:$0xf] }
  0xd2   :  { %v3209_v63 = vor.u32 %v4060_v58, %v3206_v60  ;;  %v4174_v60 = vld [vmem:[#allocation10 + $0x59c] sm:$0xf0] }
  0xd5   :  { %2159 = vmatpush.bf16.msra.mxu1 %v3845_v3 }
  0xd9   :  { %2160 = vmatpush.bf16.msra.mxu1 %v3717_v16  ;;  %v2948_v16 = vld [vmem:[#allocation10 + $0x10] sm:$0xf] }
 0x13e   :  { %v318_v19 = vpop.f32.mrf.mxu1 }
 0x13f   :  { %v319_v22 = vadd.f32 %v318_v19, %v225_v8  ;;  %v4188_v8 = vld [vmem:[#allocation10 + $0x614] sm:$0xf]  ;;  %v3588_v19 = vld [vmem:[#allocation10 + $0x510] sm:$0xf] }
 0x140   :  { %v3721_v17 = vor.u32 %v4188_v8, %v3718_v10  ;;  %v3589_v28 = vor.u32 %v4172_v20, %v3588_v19  ;;  %v3078_v8 = vld [vmem:[#allocation10 + $0x190] sm:$0xf0]  ;;  %v4045_v10 = vld [vmem:[#allocation10 + $0x194] sm:$0xf0] }
 0x141   :  { %v335_v30 = vmax.f32 %v319_v22, 0.0  ;;  %v3729_v22 = vor.u32 %v4189_v14, %v3726_v15  ;;  %v3081_v11 = vor.u32 %v4028_v6, %v3078_v8  ;;  %v3086_v14 = vld [vmem:[#allocation10 + $0x198] sm:$0xf0]  ;;  %v2950_v20 = vld [vmem:[#allocation10 + $0x90] sm:$0xf0] }
 0x142   :  { %2173 = vmatpush.bf16.msra.mxu2 %v3721_v17  ;;  %2161 = vmatpush.bf16.msra.mxu1 %v3589_v28  ;;  %v4012_v17 = vld [vmem:[#allocation10 + $0x8c] sm:$0xf0]  ;;  %v4263_v28 = vld [vmem:[%s4991_s6] ss:$0 sm:$0xff]  ;;  %v4142_v8 = vld [vmem:[#allocation10 + $0x49c] sm:$0xf0] }
 0x143   :  { %v337_v37 = vpack.c.bf16 %v335_v30, %v335_v30  ;;  %v3597_v30 = vor.u32 %v4173_v25, %v3596_v24  ;;  %v2949_v19 = vor.u32 %v4012_v17, %v2948_v16  ;;  %v3997_v25 = vld [vmem:[#allocation10 + $0x1c] sm:$0xf]  ;;  %v3486_v16 = vld [vmem:[#allocation10 + $0x4a8] sm:$0xf0]  ;;  %s4519_s6 = smov [#allocation13]  }
 0x144   :  { %v331_v42 = vpop.f32.mrf.mxu2  ;;  %v2961_v27 = vor.u32 %v3997_v25, %v2958_v26  ;;  %v3356_v25 = vld [vmem:[#allocation10 + $0x328] sm:$0xf]  ;;  %s2755_s21 = sshll.u32 %s4519_s6, 4  ;;  %s2756_s21 = int_to_ptr.vmem [resolvable:$true] %s2755_s21 }
 0x145   :  { %v332_v48 = vadd.f32 %v331_v42, %v226_v31  ;;  %479 = vmatmul.bf16.vlgmr.msra.gmra.mxu3 %v337_v37  ;;  %v3460_v31 = vld [vmem:[#allocation10 + $0x410] sm:$0xf]  ;;  %v4141_v37 = vld [vmem:[#allocation10 + $0x494] sm:$0xf0]  ;;  %v4111_v26 = vld [vmem:[#allocation10 + $0x3a4] sm:$0xf0] }
 0x146   :  { %v320_v53 = vpop.f32.mrf.mxu1  ;;  %2185 = vmatpush.bf16.msra.mxu3 %v3853_v5  ;;  %v3461_v40 = vor.u32 %v4140_v32, %v3460_v31  ;;  %2174 = vmatpush.bf16.msra.mxu2 %v3593_v29  ;;  %v3469_v42 = vor.u32 %v4141_v37, %v3468_v36  ;;  %v4044_v5 = vld [vmem:[#allocation10 + $0x18c] sm:$0xf0]  ;;  %v3862_v36 = vld [vmem:[#allocation10 + $0x7a0] sm:$0xf0]  ;;  %v3868_v37 = vld [vmem:[#allocation10 + $0x728] sm:$0xf] }
 0x147   :  { %v336_v57 = vmax.f32 %v332_v48, 0.0  ;;  %v3340_v48 = vld [vmem:[#allocation10 + $0x318] sm:$0xf]  ;;  %v3337_v53 = vor.u32 %v4092_v45, %v3334_v47  ;;  %v3077_v7 = vor.u32 %v4044_v5, %v3076_v4  ;;  %v3865_v44 = vor.u32 %v4222_v35, %v3862_v36  ;;  %v3732_v45 = vld [vmem:[#allocation10 + $0x620] sm:$0xf] }
 0x148   :  { %2162 = vmatpush.bf16.msra.mxu1 %v3461_v40  ;;  %v3341_v54 = vor.u32 %v4109_v49, %v3340_v48  ;;  %v4223_v40 = vld [vmem:[#allocation10 + $0x72c] sm:$0xf]  ;;  %v3869_v49 = vor.u32 %v4239_v38, %v3868_v37  ;;  %v4062_v35 = vld [vmem:[#allocation10 + $0x224] sm:$0xf]  ;;  %v3228_v37 = vld [vmem:[#allocation10 + $0x228] sm:$0xf] }
 0x149   :  { %v338_v1 = vpack.c.bf16 %v336_v57, %v336_v57  ;;  %v4076_v57 = vld [vmem:[#allocation10 + $0x28c] sm:$0xf0]  ;;  %v3614_v4 = vld [vmem:[#allocation10 + $0x5a8] sm:$0xf0]  ;;  %v3222_v36 = vld [vmem:[#allocation10 + $0x2a0] sm:$0xf0] }
 0x14a   :  { %2186 = vmatpush.bf16.msra.mxu3 %v3725_v18  ;;  %2175 = vmatpush.bf16.msra.mxu2 %v3465_v41  ;;  %v3205_v59 = vor.u32 %v4076_v57, %v3204_v56  ;;  %v3996_v18 = vld [vmem:[#allocation10 + $0x14] sm:$0xf]  ;;  %v3870_v41 = vld [vmem:[#allocation10 + $0x7a8] sm:$0xf0]  ;;  %v4079_v38 = vld [vmem:[#allocation10 + $0x2a4] sm:$0xf0] }
 0x14b   :  { %492 = vmatmul.bf16.vlgmr.msrb.gmra.mxu0 %v338_v1  ;;  %v4061_v1 = vld [vmem:[#allocation10 + $0x21c] sm:$0xf]  ;;  %v2953_v23 = vor.u32 %v3996_v18, %v2950_v20  ;;  %v3873_v50 = vor.u32 %v4223_v40, %v3870_v41  ;;  %v3742_v56 = vld [vmem:[#allocation10 + $0x6a8] sm:$0xf0]  ;;  %v4110_v20 = vld [vmem:[#allocation10 + $0x39c] sm:$0xf0] }
 0x14c   :  { %v333_v13 = vpop.f32.mrf.mxu2  ;;  %2198 = vmatpush.bf16.msrb.mxu0 %v3857_v9  ;;  %2163 = vmatpush.bf16.msra.mxu1 %v3333_v52  ;;  %v3217_v3 = vor.u32 %v4061_v1, %v3214_v2  ;;  %v3084_v9 = vld [vmem:[#allocation10 + $0x118] sm:$0xf]  ;;  %v3734_v52 = vld [vmem:[#allocation10 + $0x6a0] sm:$0xf0]  ;;  %v3612_v1 = vld [vmem:[#allocation10 + $0x528] sm:$0xf] }
 0x14d   :  { %v3085_v12 = vor.u32 %v4045_v10, %v3084_v9  ;;  %v4029_v13 = vld [vmem:[#allocation10 + $0x11c] sm:$0xf]  ;;  %v3737_v58 = vor.u32 %v4190_v51, %v3734_v52  ;;  %v4175_v2 = vld [vmem:[#allocation10 + $0x5a4] sm:$0xf0]  ;;  %v3230_v40 = vld [vmem:[#allocation10 + $0x2a8] sm:$0xf0] }
 0x14e   :  { %2187 = vmatpush.bf16.msra.mxu3 %v3597_v30  ;;  %2176 = vmatpush.bf16.msra.mxu2 %v3337_v53  ;;  %v3089_v15 = vor.u32 %v4029_v13, %v3086_v14  ;;  %v3740_v53 = vld [vmem:[#allocation10 + $0x628] sm:$0xf]  ;;  %v3613_v9 = vor.u32 %v4175_v2, %v3612_v1  ;;  %v4031_v52 = vld [vmem:[#allocation10 + $0x12c] sm:$0xf]  ;;  %v3876_v2 = vld [vmem:[#allocation10 + $0x730] sm:$0xf] }
 0x14f   :  { %v3484_v13 = vld [vmem:[#allocation10 + $0x428] sm:$0xf]  ;;  %v2974_v1 = vld [vmem:[#allocation10 + $0xa8] sm:$0xf0] }
 0x150   :  { %2199 = vmatpush.bf16.msrb.mxu0 %v3729_v22  ;;  %2164 = vmatpush.bf16.msra.mxu1 %v3205_v59  ;;  %v4013_v22 = vld [vmem:[#allocation10 + $0x94] sm:$0xf0]  ;;  %v3604_v59 = vld [vmem:[#allocation10 + $0x520] sm:$0xf]  ;;  %v4143_v14 = vld [vmem:[#allocation10 + $0x4a4] sm:$0xf0] }
 0x151   :  { %v2957_v24 = vor.u32 %v4013_v22, %v2956_v21  ;;  %v3605_v5 = vor.u32 %v4174_v60, %v3604_v59  ;;  %v3485_v21 = vor.u32 %v4143_v14, %v3484_v13  ;;  %v4047_v51 = vld [vmem:[#allocation10 + $0x1a4] sm:$0xf0]  ;;  %v2966_v59 = vld [vmem:[#allocation10 + $0xa0] sm:$0xf0] }
 0x152   :  { %2188 = vmatpush.bf16.msra.mxu3 %v3469_v42  ;;  %2177 = vmatpush.bf16.msra.mxu2 %v3209_v63  ;;  %v4158_v63 = vld [vmem:[#allocation10 + $0x524] sm:$0xf] }
 0x154   :  { %2200 = vmatpush.bf16.msrb.mxu0 %v3601_v34  ;;  %2165 = vmatpush.bf16.msra.mxu1 %v3077_v7  ;;  %v4238_v34 = vld [vmem:[#allocation10 + $0x79c] sm:$0xf0] }
 0x155   :  { %v3861_v43 = vor.u32 %v4238_v34, %v3860_v33  ;;  %v3476_v7 = vld [vmem:[#allocation10 + $0x420] sm:$0xf]  ;;  %v3357_v33 = vor.u32 %v4111_v26, %v3356_v25  ;;  %v3758_v25 = vld [vmem:[#allocation10 + $0x6b8] sm:$0xf0] }
 0x156   :  { %2189 = vmatpush.bf16.msra.mxu3 %v3341_v54  ;;  %2178 = vmatpush.bf16.msra.mxu2 %v3081_v11  ;;  %v4207_v54 = vld [vmem:[#allocation10 + $0x6a4] sm:$0xf0]  ;;  %v4126_v11 = vld [vmem:[#allocation10 + $0x424] sm:$0xf]  ;;  %v3477_v17 = vor.u32 %v4142_v8, %v3476_v7 }
 0x157   :  { %v3741_v61 = vor.u32 %v4207_v54, %v3740_v53  ;;  %v3102_v53 = vld [vmem:[#allocation10 + $0x1a8] sm:$0xf0]  ;;  %v2964_v54 = vld [vmem:[#allocation10 + $0x20] sm:$0xf] }
 0x158   :  { %2201 = vmatpush.bf16.msrb.mxu0 %v3473_v46  ;;  %2166 = vmatpush.bf16.msra.mxu1 %v2949_v19  ;;  %v4206_v46 = vld [vmem:[#allocation10 + $0x69c] sm:$0xf0] }
 0x159   :  { %v3733_v57 = vor.u32 %v4206_v46, %v3732_v45  ;;  %v3348_v19 = vld [vmem:[#allocation10 + $0x320] sm:$0xf]  ;;  %v3229_v46 = vor.u32 %v4079_v38, %v3228_v37  ;;  %v3630_v37 = vld [vmem:[#allocation10 + $0x5b8] sm:$0xf0] }
 0x15a   :  { %2190 = vmatpush.bf16.msra.mxu3 %v3213_v0  ;;  %2179 = vmatpush.bf16.msra.mxu2 %v2953_v23  ;;  %v3606_v0 = vld [vmem:[#allocation10 + $0x5a0] sm:$0xf0]  ;;  %v4046_v45 = vld [vmem:[#allocation10 + $0x19c] sm:$0xf0] }
 0x15b   :  { %v3609_v6 = vor.u32 %v4158_v63, %v3606_v0  ;;  %v4094_v23 = vld [vmem:[#allocation10 + $0x324] sm:$0xf]  ;;  %v4015_v63 = vld [vmem:[#allocation10 + $0xa4] sm:$0xf0]  ;;  %v3999_v0 = vld [vmem:[#allocation10 + $0x2c] sm:$0xf] }
 0x15c   :  { %2202 = vmatpush.bf16.msrb.mxu0 %v3345_v55  ;;  %v4191_v55 = vld [vmem:[#allocation10 + $0x62c] sm:$0xf]  ;;  %v2977_v13 = vor.u32 %v3999_v0, %v2974_v1  ;;  %v3236_v1 = vld [vmem:[#allocation10 + $0x230] sm:$0xf] }
 0x15d   :  { %v3745_v62 = vor.u32 %v4191_v55, %v3742_v56 }
 0x15e   :  { %2191 = vmatpush.bf16.msra.mxu3 %v3085_v12  ;;  %v3478_v12 = vld [vmem:[#allocation10 + $0x4a0] sm:$0xf0] }
 0x15f   :  { %v3481_v18 = vor.u32 %v4126_v11, %v3478_v12  ;;  %v3886_v11 = vld [vmem:[#allocation10 + $0x7b8] sm:$0xf0] }
 0x160   :  { %2203 = vmatpush.bf16.msrb.mxu0 %v3217_v3  ;;  %v4159_v3 = vld [vmem:[#allocation10 + $0x52c] sm:$0xf] }
 0x161   :  { %v3617_v10 = vor.u32 %v4159_v3, %v3614_v4  ;;  %v4240_v3 = vld [vmem:[#allocation10 + $0x7ac] sm:$0xf0]  ;;  %v4224_v4 = vld [vmem:[#allocation10 + $0x734] sm:$0xf] }
 0x162   :  { %2192 = vmatpush.bf16.msra.mxu3 %v2957_v24  ;;  %v3350_v24 = vld [vmem:[#allocation10 + $0x3a0] sm:$0xf0]  ;;  %v3877_v14 = vor.u32 %v4240_v3, %v3876_v2  ;;  %v4080_v2 = vld [vmem:[#allocation10 + $0x2ac] sm:$0xf0] }
 0x164   :  { %2204 = vmatpush.bf16.msrb.mxu0 %v3089_v15  ;;  %v4127_v15 = vld [vmem:[#allocation10 + $0x42c] sm:$0xf] }
 0x165   :  { %v3489_v22 = vor.u32 %v4127_v15, %v3486_v16  ;;  %v3748_v16 = vld [vmem:[#allocation10 + $0x630] sm:$0xf] }
 0x168   :  { %2205 = vmatpush.bf16.msrb.mxu0 %v2961_v27  ;;  %v4095_v27 = vld [vmem:[#allocation10 + $0x32c] sm:$0xf] }
 0x1c8   :  { %v480_v29 = vpop.f32.mrf.mxu3  ;;  %v493_v30 = vpop.f32.mrf.mxu0 }
 0x1c9   :  { %v481_v31 = vadd.f32 %v4263_v28, %v480_v29  ;;  %v3358_v28 = vld [vmem:[#allocation10 + $0x3a8] sm:$0xf0]  ;;  %v3349_v29 = vor.u32 %v4110_v20, %v3348_v19  ;;  %v4192_v20 = vld [vmem:[#allocation10 + $0x634] sm:$0xf] }
 0x1ca   :  { %v3361_v34 = vor.u32 %v4095_v27, %v3358_v28  ;;  %v3620_v28 = vld [vmem:[#allocation10 + $0x530] sm:$0xf] }
 0x1cb   :  { %v494_v32 = vadd.f32 %v493_v30, %v481_v31  ;;  %v3353_v30 = vor.u32 %v4094_v23, %v3350_v24  ;;  %v3220_v31 = vld [vmem:[#allocation10 + $0x220] sm:$0xf]  ;;  %v4209_v23 = vld [vmem:[#allocation10 + $0x6b4] sm:$0xf0]  ;;  %v4193_v24 = vld [vmem:[#allocation10 + $0x63c] sm:$0xf] }
 0x1cd   :  { %v497_v39 = vmax.f32 %v494_v32, 0.0  ;;  %v4078_v32 = vld [vmem:[#allocation10 + $0x29c] sm:$0xf0] }
 0x1ce   :  { %v3221_v41 = vor.u32 %v4078_v32, %v3220_v31  ;;  %v3761_v31 = vor.u32 %v4193_v24, %v3758_v25  ;;  %v4160_v32 = vld [vmem:[#allocation10 + $0x534] sm:$0xf] }
 0x1cf   :  { %v4601_v42 = vpack.c.bf16 %v497_v39, %v497_v39  ;;  %v4063_v39 = vld [vmem:[#allocation10 + $0x22c] sm:$0xf] }
 0x1d0   :  { %v482_v47 = vpop.f32.mrf.mxu3  ;;  %v495_v48 = vpop.f32.mrf.mxu0 }
 0x1d1   :  { %2115 = vmatmul.bf16.vlgmr.msrb.gmra.mxu1 %v4601_v42  ;;  %2128 = vmatmul.bf16.vlgmr.msrb.gmra.mxu2 %v4601_v42  ;;  %v3233_v47 = vor.u32 %v4063_v39, %v3230_v40  ;;  %v4030_v48 = vld [vmem:[#allocation10 + $0x124] sm:$0xf]  ;;  %v3492_v40 = vld [vmem:[#allocation10 + $0x430] sm:$0xf] }
 0x1d2   :  { %2141 = vmatmul.bf16.vlgmr.msrb.gmra.mxu3 %v4601_v42  ;;  %2154 = vmatmul.bf16.vlgmr.msra.gmra.mxu0 %v4601_v42 }
 0x1d3   :  { %2211 = vmatpush.bf16.msrb.mxu1 %v3861_v43  ;;  %2224 = vmatpush.bf16.msrb.mxu2 %v3865_v44  ;;  %v3225_v43 = vor.u32 %v4062_v35, %v3222_v36  ;;  %v3092_v44 = vld [vmem:[#allocation10 + $0x120] sm:$0xf]  ;;  %v4177_v35 = vld [vmem:[#allocation10 + $0x5b4] sm:$0xf0]  ;;  %v4161_v36 = vld [vmem:[#allocation10 + $0x53c] sm:$0xf] }
 0x1d4   :  { %2237 = vmatpush.bf16.msrb.mxu3 %v3869_v49  ;;  %2250 = vmatpush.bf16.msra.mxu0 %v3873_v50  ;;  %v3094_v49 = vld [vmem:[#allocation10 + $0x1a0] sm:$0xf0]  ;;  %v3100_v50 = vld [vmem:[#allocation10 + $0x128] sm:$0xf]  ;;  %v3093_v55 = vor.u32 %v4046_v45, %v3092_v44  ;;  %v3633_v44 = vor.u32 %v4161_v36, %v3630_v37  ;;  %v4128_v45 = vld [vmem:[#allocation10 + $0x434] sm:$0xf] }
 0x1d5   :  { %v3097_v56 = vor.u32 %v4030_v48, %v3094_v49  ;;  %v3101_v60 = vor.u32 %v4047_v51, %v3100_v50  ;;  %v4145_v48 = vld [vmem:[#allocation10 + $0x4b4] sm:$0xf0]  ;;  %v4129_v49 = vld [vmem:[#allocation10 + $0x43c] sm:$0xf]  ;;  %v4242_v36 = vld [vmem:[#allocation10 + $0x7bc] sm:$0xf0] }
 0x1d6   :  { %v3502_v50 = vld [vmem:[#allocation10 + $0x4b8] sm:$0xf0]  ;;  %v4226_v37 = vld [vmem:[#allocation10 + $0x744] sm:$0xf] }
 0x1d7   :  { %2212 = vmatpush.bf16.msrb.mxu1 %v3733_v57  ;;  %2225 = vmatpush.bf16.msrb.mxu2 %v3737_v58  ;;  %v4014_v57 = vld [vmem:[#allocation10 + $0x9c] sm:$0xf0]  ;;  %v3998_v58 = vld [vmem:[#allocation10 + $0x24] sm:$0xf] }
 0x1d8   :  { %2238 = vmatpush.bf16.msrb.mxu3 %v3741_v61  ;;  %2251 = vmatpush.bf16.msra.mxu0 %v3745_v62  ;;  %v3105_v61 = vor.u32 %v4031_v52, %v3102_v53  ;;  %v2972_v62 = vld [vmem:[#allocation10 + $0x28] sm:$0xf]  ;;  %v2965_v7 = vor.u32 %v4014_v57, %v2964_v54  ;;  %v2969_v8 = vor.u32 %v3998_v58, %v2966_v59  ;;  %v3364_v53 = vld [vmem:[#allocation10 + $0x330] sm:$0xf]  ;;  %v4096_v57 = vld [vmem:[#allocation10 + $0x334] sm:$0xf] }
 0x1d9   :  { %v2973_v12 = vor.u32 %v4015_v63, %v2972_v62  ;;  %v4112_v54 = vld [vmem:[#allocation10 + $0x3ac] sm:$0xf0]  ;;  %v3366_v58 = vld [vmem:[#allocation10 + $0x3b0] sm:$0xf0]  ;;  %v3372_v59 = vld [vmem:[#allocation10 + $0x338] sm:$0xf] }
 0x1da   :  { %v3374_v62 = vld [vmem:[#allocation10 + $0x3b8] sm:$0xf0]  ;;  %v3365_v63 = vor.u32 %v4112_v54, %v3364_v53  ;;  %v3369_v0 = vor.u32 %v4096_v57, %v3366_v58  ;;  %v4194_v54 = vld [vmem:[#allocation10 + $0x644] sm:$0xf]  ;;  %v4211_v57 = vld [vmem:[#allocation10 + $0x6c4] sm:$0xf0] }
 0x1db   :  { %2213 = vmatpush.bf16.msrb.mxu1 %v3605_v5  ;;  %2226 = vmatpush.bf16.msrb.mxu2 %v3609_v6  ;;  %v3878_v5 = vld [vmem:[#allocation10 + $0x7b0] sm:$0xf0]  ;;  %v3884_v6 = vld [vmem:[#allocation10 + $0x738] sm:$0xf]  ;;  %v4195_v58 = vld [vmem:[#allocation10 + $0x64c] sm:$0xf] }
 0x1dc   :  { %2239 = vmatpush.bf16.msrb.mxu3 %v3613_v9  ;;  %2252 = vmatpush.bf16.msra.mxu0 %v3617_v10  ;;  %v4241_v9 = vld [vmem:[#allocation10 + $0x7b4] sm:$0xf0]  ;;  %v4225_v10 = vld [vmem:[#allocation10 + $0x73c] sm:$0xf]  ;;  %v3881_v15 = vor.u32 %v4224_v4, %v3878_v5  ;;  %v4064_v5 = vld [vmem:[#allocation10 + $0x234] sm:$0xf] }
 0x1dd   :  { %v3889_v19 = vor.u32 %v4225_v10, %v3886_v11  ;;  %v3246_v10 = vld [vmem:[#allocation10 + $0x2b8] sm:$0xf0]  ;;  %v3237_v11 = vor.u32 %v4080_v2, %v3236_v1  ;;  %v4162_v2 = vld [vmem:[#allocation10 + $0x544] sm:$0xf] }
 0x1df   :  { %2214 = vmatpush.bf16.msrb.mxu1 %v3477_v17  ;;  %2227 = vmatpush.bf16.msrb.mxu2 %v3481_v18  ;;  %v4208_v17 = vld [vmem:[#allocation10 + $0x6ac] sm:$0xf0]  ;;  %v3885_v18 = vor.u32 %v4241_v9, %v3884_v6  ;;  %v3238_v6 = vld [vmem:[#allocation10 + $0x2b0] sm:$0xf0]  ;;  %v4065_v9 = vld [vmem:[#allocation10 + $0x23c] sm:$0xf] }
 0x1e0   :  { %2240 = vmatpush.bf16.msrb.mxu3 %v3485_v21  ;;  %2253 = vmatpush.bf16.msra.mxu0 %v3489_v22  ;;  %v3750_v21 = vld [vmem:[#allocation10 + $0x6b0] sm:$0xf0]  ;;  %v3756_v22 = vld [vmem:[#allocation10 + $0x638] sm:$0xf]  ;;  %v3749_v26 = vor.u32 %v4208_v17, %v3748_v16  ;;  %v3249_v16 = vor.u32 %v4065_v9, %v3246_v10  ;;  %v3508_v10 = vld [vmem:[#allocation10 + $0x440] sm:$0xf] }
 0x1e1   :  { %2167 = vmatmul.bf16.vlgmr.msra.gmra.mxu1 %v4601_v42  ;;  %2180 = vmatmul.bf16.vlgmr.msra.gmra.mxu2 %v4601_v42  ;;  %v3753_v27 = vor.u32 %v4192_v20, %v3750_v21  ;;  %v4032_v17 = vld [vmem:[#allocation10 + $0x134] sm:$0xf]  ;;  %v4049_v20 = vld [vmem:[#allocation10 + $0x1b4] sm:$0xf0]  ;;  %v4033_v21 = vld [vmem:[#allocation10 + $0x13c] sm:$0xf] }
 0x1e2   :  { %2193 = vmatmul.bf16.vlgmr.msra.gmra.mxu3 %v4601_v42  ;;  %2206 = vmatmul.bf16.vlgmr.msrb.gmra.mxu0 %v4601_v42 }
 0x1e3   :  { %2215 = vmatpush.bf16.msrb.mxu1 %v3349_v29  ;;  %2228 = vmatpush.bf16.msrb.mxu2 %v3353_v30  ;;  %v4176_v29 = vld [vmem:[#allocation10 + $0x5ac] sm:$0xf0]  ;;  %v3757_v30 = vor.u32 %v4209_v23, %v3756_v22  ;;  %v3118_v22 = vld [vmem:[#allocation10 + $0x1b8] sm:$0xf0] }
 0x1e4   :  { %2241 = vmatpush.bf16.msrb.mxu3 %v3357_v33  ;;  %2254 = vmatpush.bf16.msra.mxu0 %v3361_v34  ;;  %v3622_v33 = vld [vmem:[#allocation10 + $0x5b0] sm:$0xf0]  ;;  %v3628_v34 = vld [vmem:[#allocation10 + $0x538] sm:$0xf]  ;;  %v3621_v38 = vor.u32 %v4176_v29, %v3620_v28  ;;  %v2980_v23 = vld [vmem:[#allocation10 + $0x30] sm:$0xf] }
 0x1e5   :  { %v3625_v39 = vor.u32 %v4160_v32, %v3622_v33  ;;  %v2982_v28 = vld [vmem:[#allocation10 + $0xb0] sm:$0xf0]  ;;  %v4017_v32 = vld [vmem:[#allocation10 + $0xb4] sm:$0xf0]  ;;  %v4001_v33 = vld [vmem:[#allocation10 + $0x3c] sm:$0xf] }
 0x1e7   :  { %2216 = vmatpush.bf16.msrb.mxu1 %v3221_v41  ;;  %2229 = vmatpush.bf16.msrb.mxu2 %v3225_v43  ;;  %v4144_v41 = vld [vmem:[#allocation10 + $0x4ac] sm:$0xf0]  ;;  %v3629_v43 = vor.u32 %v4177_v35, %v3628_v34  ;;  %v2990_v34 = vld [vmem:[#allocation10 + $0xb8] sm:$0xf0]  ;;  %v3892_v35 = vld [vmem:[#allocation10 + $0x740] sm:$0xf] }
 0x1e8   :  { %2242 = vmatpush.bf16.msrb.mxu3 %v3229_v46  ;;  %2255 = vmatpush.bf16.msra.mxu0 %v3233_v47  ;;  %v3494_v46 = vld [vmem:[#allocation10 + $0x4b0] sm:$0xf0]  ;;  %v3500_v47 = vld [vmem:[#allocation10 + $0x438] sm:$0xf]  ;;  %v3493_v51 = vor.u32 %v4144_v41, %v3492_v40 }
 0x1e9   :  { %v3497_v52 = vor.u32 %v4128_v45, %v3494_v46  ;;  %v3902_v45 = vld [vmem:[#allocation10 + $0x7c8] sm:$0xf0] }
 0x1eb   :  { %2217 = vmatpush.bf16.msrb.mxu1 %v3093_v55  ;;  %2230 = vmatpush.bf16.msrb.mxu2 %v3097_v56  ;;  %v3501_v55 = vor.u32 %v4145_v48, %v3500_v47  ;;  %v3505_v56 = vor.u32 %v4129_v49, %v3502_v50  ;;  %v2993_v47 = vor.u32 %v4001_v33, %v2990_v34  ;;  %v3764_v50 = vld [vmem:[#allocation10 + $0x640] sm:$0xf] }
 0x1ec   :  { %2243 = vmatpush.bf16.msrb.mxu3 %v3101_v60  ;;  %2256 = vmatpush.bf16.msra.mxu0 %v3105_v61  ;;  %v4113_v60 = vld [vmem:[#allocation10 + $0x3b4] sm:$0xf0]  ;;  %v4097_v61 = vld [vmem:[#allocation10 + $0x33c] sm:$0xf]  ;;  %v3893_v48 = vor.u32 %v4242_v36, %v3892_v35  ;;  %v3252_v34 = vld [vmem:[#allocation10 + $0x240] sm:$0xf] }
 0x1ed   :  { %v3373_v3 = vor.u32 %v4113_v60, %v3372_v59  ;;  %v3377_v4 = vor.u32 %v4097_v61, %v3374_v62  ;;  %v3774_v59 = vld [vmem:[#allocation10 + $0x6c8] sm:$0xf0]  ;;  %v3636_v62 = vld [vmem:[#allocation10 + $0x540] sm:$0xf] }
 0x1ee   :  { %v3777_v1 = vor.u32 %v4195_v58, %v3774_v59  ;;  %v4082_v35 = vld [vmem:[#allocation10 + $0x2bc] sm:$0xf0] }
 0x1ef   :  { %2218 = vmatpush.bf16.msrb.mxu1 %v2965_v7  ;;  %2231 = vmatpush.bf16.msrb.mxu2 %v2969_v8  ;;  %v3244_v7 = vld [vmem:[#allocation10 + $0x238] sm:$0xf] }
 0x1f0   :  { %2244 = vmatpush.bf16.msrb.mxu3 %v2973_v12  ;;  %2257 = vmatpush.bf16.msra.mxu0 %v2977_v13  ;;  %v4081_v8 = vld [vmem:[#allocation10 + $0x2b4] sm:$0xf0]  ;;  %v3241_v12 = vor.u32 %v4064_v5, %v3238_v6  ;;  %v3108_v13 = vld [vmem:[#allocation10 + $0x130] sm:$0xf]  ;;  %v4179_v5 = vld [vmem:[#allocation10 + $0x5c4] sm:$0xf0] }
 0x1f1   :  { %v4163_v6 = vld [vmem:[#allocation10 + $0x54c] sm:$0xf] }
 0x1f2   :  { %2219 = vmatmul.bf16.vlgmr.msrb.gmra.mxu1 %v4601_v42  ;;  %2232 = vmatmul.bf16.vlgmr.msrb.gmra.mxu2 %v4601_v42 }
 0x1f3   :  { %2263 = vmatpush.bf16.msra.mxu1 %v3877_v14  ;;  %2276 = vmatpush.bf16.msra.mxu2 %v3881_v15  ;;  %v4048_v14 = vld [vmem:[#allocation10 + $0x1ac] sm:$0xf0]  ;;  %v3245_v15 = vor.u32 %v4081_v8, %v3244_v7  ;;  %v3646_v7 = vld [vmem:[#allocation10 + $0x5c8] sm:$0xf0] }
 0x1f4   :  { %2289 = vmatpush.bf16.msra.mxu3 %v3885_v18  ;;  %2302 = vmatpush.bf16.msrb.mxu0 %v3889_v19  ;;  %v3110_v18 = vld [vmem:[#allocation10 + $0x1b0] sm:$0xf0]  ;;  %v3116_v19 = vld [vmem:[#allocation10 + $0x138] sm:$0xf]  ;;  %v3109_v24 = vor.u32 %v4048_v14, %v3108_v13  ;;  %v3649_v13 = vor.u32 %v4163_v6, %v3646_v7  ;;  %v4130_v14 = vld [vmem:[#allocation10 + $0x444] sm:$0xf] }
 0x1f5   :  { %2245 = vmatmul.bf16.vlgmr.msrb.gmra.mxu3 %v4601_v42  ;;  %2258 = vmatmul.bf16.vlgmr.msra.gmra.mxu0 %v4601_v42  ;;  %v3113_v25 = vor.u32 %v4032_v17, %v3110_v18  ;;  %v3117_v29 = vor.u32 %v4049_v20, %v3116_v19  ;;  %v4147_v17 = vld [vmem:[#allocation10 + $0x4c4] sm:$0xf0]  ;;  %v4131_v18 = vld [vmem:[#allocation10 + $0x44c] sm:$0xf]  ;;  %v4244_v6 = vld [vmem:[#allocation10 + $0x7cc] sm:$0xf0] }
 0x1f6   :  { %v3518_v19 = vld [vmem:[#allocation10 + $0x4c8] sm:$0xf0]  ;;  %v4228_v7 = vld [vmem:[#allocation10 + $0x754] sm:$0xf] }
 0x1f7   :  { %2264 = vmatpush.bf16.msra.mxu1 %v3749_v26  ;;  %2277 = vmatpush.bf16.msra.mxu2 %v3753_v27  ;;  %v4016_v26 = vld [vmem:[#allocation10 + $0xac] sm:$0xf0]  ;;  %v4000_v27 = vld [vmem:[#allocation10 + $0x34] sm:$0xf] }
 0x1f8   :  { %2290 = vmatpush.bf16.msra.mxu3 %v3757_v30  ;;  %2303 = vmatpush.bf16.msrb.mxu0 %v3761_v31  ;;  %v3121_v30 = vor.u32 %v4033_v21, %v3118_v22  ;;  %v2988_v31 = vld [vmem:[#allocation10 + $0x38] sm:$0xf]  ;;  %v2981_v40 = vor.u32 %v4016_v26, %v2980_v23  ;;  %v2985_v41 = vor.u32 %v4000_v27, %v2982_v28  ;;  %v3380_v22 = vld [vmem:[#allocation10 + $0x340] sm:$0xf]  ;;  %v4098_v26 = vld [vmem:[#allocation10 + $0x344] sm:$0xf] }
 0x1f9   :  { %v2989_v46 = vor.u32 %v4017_v32, %v2988_v31  ;;  %v4114_v23 = vld [vmem:[#allocation10 + $0x3bc] sm:$0xf0]  ;;  %v3382_v27 = vld [vmem:[#allocation10 + $0x3c0] sm:$0xf0]  ;;  %v3388_v28 = vld [vmem:[#allocation10 + $0x348] sm:$0xf] }
 0x1fa   :  { %v3390_v31 = vld [vmem:[#allocation10 + $0x3c8] sm:$0xf0]  ;;  %v3381_v32 = vor.u32 %v4114_v23, %v3380_v22  ;;  %v3385_v33 = vor.u32 %v4098_v26, %v3382_v27  ;;  %v4196_v23 = vld [vmem:[#allocation10 + $0x654] sm:$0xf]  ;;  %v4213_v26 = vld [vmem:[#allocation10 + $0x6d4] sm:$0xf0] }
 0x1fb   :  { %2265 = vmatpush.bf16.msra.mxu1 %v3621_v38  ;;  %2278 = vmatpush.bf16.msra.mxu2 %v3625_v39  ;;  %v3894_v38 = vld [vmem:[#allocation10 + $0x7c0] sm:$0xf0]  ;;  %v3900_v39 = vld [vmem:[#allocation10 + $0x748] sm:$0xf]  ;;  %v4197_v27 = vld [vmem:[#allocation10 + $0x65c] sm:$0xf] }
 0x1fc   :  { %2291 = vmatpush.bf16.msra.mxu3 %v3629_v43  ;;  %2304 = vmatpush.bf16.msrb.mxu0 %v3633_v44  ;;  %v4243_v43 = vld [vmem:[#allocation10 + $0x7c4] sm:$0xf0]  ;;  %v4227_v44 = vld [vmem:[#allocation10 + $0x74c] sm:$0xf]  ;;  %v3897_v49 = vor.u32 %v4226_v37, %v3894_v38  ;;  %v4066_v38 = vld [vmem:[#allocation10 + $0x244] sm:$0xf] }
 0x1fd   :  { %v3905_v53 = vor.u32 %v4227_v44, %v3902_v45  ;;  %v3262_v44 = vld [vmem:[#allocation10 + $0x2c8] sm:$0xf0]  ;;  %v3253_v45 = vor.u32 %v4082_v35, %v3252_v34  ;;  %v4164_v35 = vld [vmem:[#allocation10 + $0x554] sm:$0xf] }
 0x1ff   :  { %2266 = vmatpush.bf16.msra.mxu1 %v3493_v51  ;;  %2279 = vmatpush.bf16.msra.mxu2 %v3497_v52  ;;  %v4210_v51 = vld [vmem:[#allocation10 + $0x6bc] sm:$0xf0]  ;;  %v3901_v52 = vor.u32 %v4243_v43, %v3900_v39  ;;  %v3254_v39 = vld [vmem:[#allocation10 + $0x2c0] sm:$0xf0]  ;;  %v4067_v43 = vld [vmem:[#allocation10 + $0x24c] sm:$0xf] }
 0x200   :  { %2292 = vmatpush.bf16.msra.mxu3 %v3501_v55  ;;  %2305 = vmatpush.bf16.msrb.mxu0 %v3505_v56  ;;  %v3766_v55 = vld [vmem:[#allocation10 + $0x6c0] sm:$0xf0]  ;;  %v3772_v56 = vld [vmem:[#allocation10 + $0x648] sm:$0xf]  ;;  %v3765_v60 = vor.u32 %v4210_v51, %v3764_v50  ;;  %v3265_v50 = vor.u32 %v4067_v43, %v3262_v44  ;;  %v3524_v44 = vld [vmem:[#allocation10 + $0x450] sm:$0xf] }
 0x201   :  { %v3769_v61 = vor.u32 %v4194_v54, %v3766_v55  ;;  %v4034_v51 = vld [vmem:[#allocation10 + $0x144] sm:$0xf]  ;;  %v4051_v54 = vld [vmem:[#allocation10 + $0x1c4] sm:$0xf0]  ;;  %v4035_v55 = vld [vmem:[#allocation10 + $0x14c] sm:$0xf] }
 0x203   :  { %2267 = vmatpush.bf16.msra.mxu1 %v3365_v63  ;;  %2280 = vmatpush.bf16.msra.mxu2 %v3369_v0  ;;  %v4178_v63 = vld [vmem:[#allocation10 + $0x5bc] sm:$0xf0]  ;;  %v3773_v0 = vor.u32 %v4211_v57, %v3772_v56  ;;  %v3134_v56 = vld [vmem:[#allocation10 + $0x1c8] sm:$0xf0] }
 0x204   :  { %2293 = vmatpush.bf16.msra.mxu3 %v3373_v3  ;;  %2306 = vmatpush.bf16.msrb.mxu0 %v3377_v4  ;;  %v3638_v3 = vld [vmem:[#allocation10 + $0x5c0] sm:$0xf0]  ;;  %v3644_v4 = vld [vmem:[#allocation10 + $0x548] sm:$0xf]  ;;  %v3637_v8 = vor.u32 %v4178_v63, %v3636_v62  ;;  %v2996_v57 = vld [vmem:[#allocation10 + $0x40] sm:$0xf] }
 0x205   :  { %v3641_v9 = vor.u32 %v4162_v2, %v3638_v3  ;;  %v2998_v62 = vld [vmem:[#allocation10 + $0xc0] sm:$0xf0]  ;;  %v4019_v2 = vld [vmem:[#allocation10 + $0xc4] sm:$0xf0]  ;;  %v4003_v3 = vld [vmem:[#allocation10 + $0x4c] sm:$0xf] }
 0x207   :  { %2268 = vmatpush.bf16.msra.mxu1 %v3237_v11  ;;  %2281 = vmatpush.bf16.msra.mxu2 %v3241_v12  ;;  %v4146_v11 = vld [vmem:[#allocation10 + $0x4bc] sm:$0xf0]  ;;  %v3645_v12 = vor.u32 %v4179_v5, %v3644_v4  ;;  %v3006_v4 = vld [vmem:[#allocation10 + $0xc8] sm:$0xf0]  ;;  %v3908_v5 = vld [vmem:[#allocation10 + $0x750] sm:$0xf] }
 0x208   :  { %2294 = vmatpush.bf16.msra.mxu3 %v3245_v15  ;;  %2307 = vmatpush.bf16.msrb.mxu0 %v3249_v16  ;;  %v3510_v15 = vld [vmem:[#allocation10 + $0x4c0] sm:$0xf0]  ;;  %v3516_v16 = vld [vmem:[#allocation10 + $0x448] sm:$0xf]  ;;  %v3509_v20 = vor.u32 %v4146_v11, %v3508_v10 }
 0x209   :  { %v3513_v21 = vor.u32 %v4130_v14, %v3510_v15  ;;  %v3918_v14 = vld [vmem:[#allocation10 + $0x7d8] sm:$0xf0] }
 0x20b   :  { %2269 = vmatpush.bf16.msra.mxu1 %v3109_v24  ;;  %2282 = vmatpush.bf16.msra.mxu2 %v3113_v25  ;;  %v3517_v24 = vor.u32 %v4147_v17, %v3516_v16  ;;  %v3521_v25 = vor.u32 %v4131_v18, %v3518_v19  ;;  %v3009_v16 = vor.u32 %v4003_v3, %v3006_v4  ;;  %v3780_v19 = vld [vmem:[#allocation10 + $0x650] sm:$0xf] }
 0x20c   :  { %2295 = vmatpush.bf16.msra.mxu3 %v3117_v29  ;;  %2308 = vmatpush.bf16.msrb.mxu0 %v3121_v30  ;;  %v4115_v29 = vld [vmem:[#allocation10 + $0x3c4] sm:$0xf0]  ;;  %v4099_v30 = vld [vmem:[#allocation10 + $0x34c] sm:$0xf]  ;;  %v3909_v17 = vor.u32 %v4244_v6, %v3908_v5  ;;  %v3268_v4 = vld [vmem:[#allocation10 + $0x250] sm:$0xf] }
 0x20d   :  { %v3389_v36 = vor.u32 %v4115_v29, %v3388_v28  ;;  %v3393_v37 = vor.u32 %v4099_v30, %v3390_v31  ;;  %v3790_v28 = vld [vmem:[#allocation10 + $0x6d8] sm:$0xf0]  ;;  %v3652_v31 = vld [vmem:[#allocation10 + $0x550] sm:$0xf] }
 0x20e   :  { %v3793_v34 = vor.u32 %v4197_v27, %v3790_v28  ;;  %v4084_v5 = vld [vmem:[#allocation10 + $0x2cc] sm:$0xf0] }
 0x20f   :  { %2270 = vmatpush.bf16.msra.mxu1 %v2981_v40  ;;  %2283 = vmatpush.bf16.msra.mxu2 %v2985_v41  ;;  %v3260_v40 = vld [vmem:[#allocation10 + $0x248] sm:$0xf] }
 0x210   :  { %2296 = vmatpush.bf16.msra.mxu3 %v2989_v46  ;;  %2309 = vmatpush.bf16.msrb.mxu0 %v2993_v47  ;;  %v4083_v41 = vld [vmem:[#allocation10 + $0x2c4] sm:$0xf0]  ;;  %v3257_v46 = vor.u32 %v4066_v38, %v3254_v39  ;;  %v3124_v47 = vld [vmem:[#allocation10 + $0x140] sm:$0xf]  ;;  %v4181_v38 = vld [vmem:[#allocation10 + $0x5d4] sm:$0xf0] }
 0x211   :  { %v4165_v39 = vld [vmem:[#allocation10 + $0x55c] sm:$0xf] }
 0x212   :  { %2271 = vmatmul.bf16.vlgmr.msra.gmra.mxu1 %v4601_v42  ;;  %2284 = vmatmul.bf16.vlgmr.msra.gmra.mxu2 %v4601_v42 }
 0x213   :  { %2315 = vmatpush.bf16.msrb.mxu1 %v3893_v48  ;;  %2328 = vmatpush.bf16.msrb.mxu2 %v3897_v49  ;;  %v4050_v48 = vld [vmem:[#allocation10 + $0x1bc] sm:$0xf0]  ;;  %v3261_v49 = vor.u32 %v4083_v41, %v3260_v40  ;;  %v3662_v40 = vld [vmem:[#allocation10 + $0x5d8] sm:$0xf0] }
 0x214   :  { %2341 = vmatpush.bf16.msrb.mxu3 %v3901_v52  ;;  %2354 = vmatpush.bf16.msra.mxu0 %v3905_v53  ;;  %v3126_v52 = vld [vmem:[#allocation10 + $0x1c0] sm:$0xf0]  ;;  %v3132_v53 = vld [vmem:[#allocation10 + $0x148] sm:$0xf]  ;;  %v3125_v58 = vor.u32 %v4050_v48, %v3124_v47  ;;  %v3665_v47 = vor.u32 %v4165_v39, %v3662_v40  ;;  %v4132_v48 = vld [vmem:[#allocation10 + $0x454] sm:$0xf] }
 0x215   :  { %2297 = vmatmul.bf16.vlgmr.msra.gmra.mxu3 %v4601_v42  ;;  %2310 = vmatmul.bf16.vlgmr.msrb.gmra.mxu0 %v4601_v42  ;;  %v3129_v59 = vor.u32 %v4034_v51, %v3126_v52  ;;  %v3133_v63 = vor.u32 %v4051_v54, %v3132_v53  ;;  %v4149_v51 = vld [vmem:[#allocation10 + $0x4d4] sm:$0xf0]  ;;  %v4133_v52 = vld [vmem:[#allocation10 + $0x45c] sm:$0xf]  ;;  %v4246_v39 = vld [vmem:[#allocation10 + $0x7dc] sm:$0xf0] }
 0x216   :  { %v3534_v53 = vld [vmem:[#allocation10 + $0x4d8] sm:$0xf0]  ;;  %v4230_v40 = vld [vmem:[#allocation10 + $0x764] sm:$0xf] }
 0x217   :  { %2316 = vmatpush.bf16.msrb.mxu1 %v3765_v60  ;;  %2329 = vmatpush.bf16.msrb.mxu2 %v3769_v61  ;;  %v4018_v60 = vld [vmem:[#allocation10 + $0xbc] sm:$0xf0]  ;;  %v4002_v61 = vld [vmem:[#allocation10 + $0x44] sm:$0xf] }
 0x218   :  { %2342 = vmatpush.bf16.msrb.mxu3 %v3773_v0  ;;  %2355 = vmatpush.bf16.msra.mxu0 %v3777_v1  ;;  %v3137_v0 = vor.u32 %v4035_v55, %v3134_v56  ;;  %v3004_v1 = vld [vmem:[#allocation10 + $0x48] sm:$0xf]  ;;  %v2997_v10 = vor.u32 %v4018_v60, %v2996_v57  ;;  %v3001_v11 = vor.u32 %v4002_v61, %v2998_v62  ;;  %v3396_v56 = vld [vmem:[#allocation10 + $0x350] sm:$0xf]  ;;  %v4100_v60 = vld [vmem:[#allocation10 + $0x354] sm:$0xf] }
 0x219   :  { %v3005_v15 = vor.u32 %v4019_v2, %v3004_v1  ;;  %v4116_v57 = vld [vmem:[#allocation10 + $0x3cc] sm:$0xf0]  ;;  %v3398_v61 = vld [vmem:[#allocation10 + $0x3d0] sm:$0xf0]  ;;  %v3404_v62 = vld [vmem:[#allocation10 + $0x358] sm:$0xf] }
 0x21a   :  { %v3406_v1 = vld [vmem:[#allocation10 + $0x3d8] sm:$0xf0]  ;;  %v3397_v2 = vor.u32 %v4116_v57, %v3396_v56  ;;  %v3401_v3 = vor.u32 %v4100_v60, %v3398_v61  ;;  %v4198_v57 = vld [vmem:[#allocation10 + $0x664] sm:$0xf]  ;;  %v4215_v60 = vld [vmem:[#allocation10 + $0x6e4] sm:$0xf0] }
 0x21b   :  { %2317 = vmatpush.bf16.msrb.mxu1 %v3637_v8  ;;  %2330 = vmatpush.bf16.msrb.mxu2 %v3641_v9  ;;  %v3910_v8 = vld [vmem:[#allocation10 + $0x7d0] sm:$0xf0]  ;;  %v3916_v9 = vld [vmem:[#allocation10 + $0x758] sm:$0xf]  ;;  %v4199_v61 = vld [vmem:[#allocation10 + $0x66c] sm:$0xf] }
 0x21c   :  { %2343 = vmatpush.bf16.msrb.mxu3 %v3645_v12  ;;  %2356 = vmatpush.bf16.msra.mxu0 %v3649_v13  ;;  %v4245_v12 = vld [vmem:[#allocation10 + $0x7d4] sm:$0xf0]  ;;  %v4229_v13 = vld [vmem:[#allocation10 + $0x75c] sm:$0xf]  ;;  %v3913_v18 = vor.u32 %v4228_v7, %v3910_v8  ;;  %v4068_v8 = vld [vmem:[#allocation10 + $0x254] sm:$0xf] }
 0x21d   :  { %v3921_v22 = vor.u32 %v4229_v13, %v3918_v14  ;;  %v3278_v13 = vld [vmem:[#allocation10 + $0x2d8] sm:$0xf0]  ;;  %v3269_v14 = vor.u32 %v4084_v5, %v3268_v4  ;;  %v4166_v5 = vld [vmem:[#allocation10 + $0x564] sm:$0xf] }
 0x21f   :  { %2318 = vmatpush.bf16.msrb.mxu1 %v3509_v20  ;;  %2331 = vmatpush.bf16.msrb.mxu2 %v3513_v21  ;;  %v4212_v20 = vld [vmem:[#allocation10 + $0x6cc] sm:$0xf0]  ;;  %v3917_v21 = vor.u32 %v4245_v12, %v3916_v9  ;;  %v3270_v9 = vld [vmem:[#allocation10 + $0x2d0] sm:$0xf0]  ;;  %v4069_v12 = vld [vmem:[#allocation10 + $0x25c] sm:$0xf] }
 0x220   :  { %2344 = vmatpush.bf16.msrb.mxu3 %v3517_v24  ;;  %2357 = vmatpush.bf16.msra.mxu0 %v3521_v25  ;;  %v3782_v24 = vld [vmem:[#allocation10 + $0x6d0] sm:$0xf0]  ;;  %v3788_v25 = vld [vmem:[#allocation10 + $0x658] sm:$0xf]  ;;  %v3781_v29 = vor.u32 %v4212_v20, %v3780_v19  ;;  %v3281_v19 = vor.u32 %v4069_v12, %v3278_v13 }
 0x221   :  { %v3785_v30 = vor.u32 %v4196_v23, %v3782_v24  ;;  %v4036_v20 = vld [vmem:[#allocation10 + $0x154] sm:$0xf]  ;;  %v4053_v23 = vld [vmem:[#allocation10 + $0x1d4] sm:$0xf0]  ;;  %v4037_v24 = vld [vmem:[#allocation10 + $0x15c] sm:$0xf] }
 0x223   :  { %2319 = vmatpush.bf16.msrb.mxu1 %v3381_v32  ;;  %2332 = vmatpush.bf16.msrb.mxu2 %v3385_v33  ;;  %v4180_v32 = vld [vmem:[#allocation10 + $0x5cc] sm:$0xf0]  ;;  %v3789_v33 = vor.u32 %v4213_v26, %v3788_v25  ;;  %v3150_v25 = vld [vmem:[#allocation10 + $0x1d8] sm:$0xf0] }
 0x224   :  { %2345 = vmatpush.bf16.msrb.mxu3 %v3389_v36  ;;  %2358 = vmatpush.bf16.msra.mxu0 %v3393_v37  ;;  %v3654_v36 = vld [vmem:[#allocation10 + $0x5d0] sm:$0xf0]  ;;  %v3660_v37 = vld [vmem:[#allocation10 + $0x558] sm:$0xf]  ;;  %v3653_v41 = vor.u32 %v4180_v32, %v3652_v31  ;;  %v3012_v26 = vld [vmem:[#allocation10 + $0x50] sm:$0xf] }
 0x225   :  { %v3657_v43 = vor.u32 %v4164_v35, %v3654_v36  ;;  %v3014_v31 = vld [vmem:[#allocation10 + $0xd0] sm:$0xf0]  ;;  %v4021_v35 = vld [vmem:[#allocation10 + $0xd4] sm:$0xf0]  ;;  %v4005_v36 = vld [vmem:[#allocation10 + $0x5c] sm:$0xf] }
 0x227   :  { %2320 = vmatpush.bf16.msrb.mxu1 %v3253_v45  ;;  %2333 = vmatpush.bf16.msrb.mxu2 %v3257_v46  ;;  %v4148_v45 = vld [vmem:[#allocation10 + $0x4cc] sm:$0xf0]  ;;  %v3661_v46 = vor.u32 %v4181_v38, %v3660_v37  ;;  %v3022_v37 = vld [vmem:[#allocation10 + $0xd8] sm:$0xf0]  ;;  %v3924_v38 = vld [vmem:[#allocation10 + $0x760] sm:$0xf] }
 0x228   :  { %2346 = vmatpush.bf16.msrb.mxu3 %v3261_v49  ;;  %2359 = vmatpush.bf16.msra.mxu0 %v3265_v50  ;;  %v3526_v49 = vld [vmem:[#allocation10 + $0x4d0] sm:$0xf0]  ;;  %v3532_v50 = vld [vmem:[#allocation10 + $0x458] sm:$0xf]  ;;  %v3525_v54 = vor.u32 %v4148_v45, %v3524_v44 }
 0x229   :  { %v3529_v55 = vor.u32 %v4132_v48, %v3526_v49  ;;  %v3934_v48 = vld [vmem:[#allocation10 + $0x7e8] sm:$0xf0] }
 0x22b   :  { %2321 = vmatpush.bf16.msrb.mxu1 %v3125_v58  ;;  %2334 = vmatpush.bf16.msrb.mxu2 %v3129_v59  ;;  %v3533_v58 = vor.u32 %v4149_v51, %v3532_v50  ;;  %v3537_v59 = vor.u32 %v4133_v52, %v3534_v53  ;;  %v3025_v50 = vor.u32 %v4005_v36, %v3022_v37  ;;  %v3796_v53 = vld [vmem:[#allocation10 + $0x660] sm:$0xf]  ;;  %v4119_v36 = vld [vmem:[#allocation10 + $0x3e4] sm:$0xf0]  ;;  %v4103_v37 = vld [vmem:[#allocation10 + $0x36c] sm:$0xf] }
 0x22c   :  { %2347 = vmatpush.bf16.msrb.mxu3 %v3133_v63  ;;  %2360 = vmatpush.bf16.msra.mxu0 %v3137_v0  ;;  %v4117_v63 = vld [vmem:[#allocation10 + $0x3d4] sm:$0xf0]  ;;  %v4101_v0 = vld [vmem:[#allocation10 + $0x35c] sm:$0xf]  ;;  %v3925_v51 = vor.u32 %v4246_v39, %v3924_v38  ;;  %v3422_v38 = vld [vmem:[#allocation10 + $0x3e8] sm:$0xf0] }
 0x22d   :  { %v3405_v6 = vor.u32 %v4117_v63, %v3404_v62  ;;  %v3409_v7 = vor.u32 %v4101_v0, %v3406_v1  ;;  %v3806_v62 = vld [vmem:[#allocation10 + $0x6e8] sm:$0xf0]  ;;  %v3668_v1 = vld [vmem:[#allocation10 + $0x560] sm:$0xf] }
 0x22e   :  { %v3809_v4 = vor.u32 %v4199_v61, %v3806_v62  ;;  %v4038_v61 = vld [vmem:[#allocation10 + $0x164] sm:$0xf] }
 0x22f   :  { %2322 = vmatpush.bf16.msrb.mxu1 %v2997_v10  ;;  %2335 = vmatpush.bf16.msrb.mxu2 %v3001_v11  ;;  %v3276_v10 = vld [vmem:[#allocation10 + $0x258] sm:$0xf]  ;;  %v3158_v62 = vld [vmem:[#allocation10 + $0x1e0] sm:$0xf0] }
 0x230   :  { %2348 = vmatpush.bf16.msrb.mxu3 %v3005_v15  ;;  %2361 = vmatpush.bf16.msra.mxu0 %v3009_v16  ;;  %v4085_v11 = vld [vmem:[#allocation10 + $0x2d4] sm:$0xf0]  ;;  %v3273_v15 = vor.u32 %v4068_v8, %v3270_v9  ;;  %v3140_v16 = vld [vmem:[#allocation10 + $0x150] sm:$0xf]  ;;  %v4183_v8 = vld [vmem:[#allocation10 + $0x5e4] sm:$0xf0] }
 0x231   :  { %v4167_v9 = vld [vmem:[#allocation10 + $0x56c] sm:$0xf] }
 0x232   :  { %2323 = vmatmul.bf16.vlgmr.msrb.gmra.mxu1 %v4601_v42  ;;  %2336 = vmatmul.bf16.vlgmr.msrb.gmra.mxu2 %v4601_v42 }
 0x233   :  { %2367 = vmatpush.bf16.msra.mxu1 %v3909_v17  ;;  %2380 = vmatpush.bf16.msra.mxu2 %v3913_v18  ;;  %v4052_v17 = vld [vmem:[#allocation10 + $0x1cc] sm:$0xf0]  ;;  %v3277_v18 = vor.u32 %v4085_v11, %v3276_v10  ;;  %v3678_v10 = vld [vmem:[#allocation10 + $0x5e8] sm:$0xf0] }
 0x234   :  { %2393 = vmatpush.bf16.msra.mxu3 %v3917_v21  ;;  %2406 = vmatpush.bf16.msrb.mxu0 %v3921_v22  ;;  %v3142_v21 = vld [vmem:[#allocation10 + $0x1d0] sm:$0xf0]  ;;  %v3148_v22 = vld [vmem:[#allocation10 + $0x158] sm:$0xf]  ;;  %v3141_v27 = vor.u32 %v4052_v17, %v3140_v16  ;;  %v4150_v16 = vld [vmem:[#allocation10 + $0x4dc] sm:$0xf0] }
 0x235   :  { %2349 = vmatmul.bf16.vlgmr.msrb.gmra.mxu3 %v4601_v42  ;;  %2362 = vmatmul.bf16.vlgmr.msra.gmra.mxu0 %v4601_v42  ;;  %v3145_v28 = vor.u32 %v4036_v20, %v3142_v21  ;;  %v3149_v32 = vor.u32 %v4053_v23, %v3148_v22  ;;  %v3542_v20 = vld [vmem:[#allocation10 + $0x4e0] sm:$0xf0]  ;;  %v3548_v21 = vld [vmem:[#allocation10 + $0x468] sm:$0xf]  ;;  %v4135_v23 = vld [vmem:[#allocation10 + $0x46c] sm:$0xf] }
 0x236   :  { %v4151_v22 = vld [vmem:[#allocation10 + $0x4e4] sm:$0xf0] }
 0x237   :  { %2368 = vmatpush.bf16.msra.mxu1 %v3781_v29  ;;  %2381 = vmatpush.bf16.msra.mxu2 %v3785_v30  ;;  %v4020_v29 = vld [vmem:[#allocation10 + $0xcc] sm:$0xf0]  ;;  %v4004_v30 = vld [vmem:[#allocation10 + $0x54] sm:$0xf] }
 0x238   :  { %2394 = vmatpush.bf16.msra.mxu3 %v3789_v33  ;;  %2407 = vmatpush.bf16.msrb.mxu0 %v3793_v34  ;;  %v3153_v33 = vor.u32 %v4037_v24, %v3150_v25  ;;  %v3020_v34 = vld [vmem:[#allocation10 + $0x58] sm:$0xf]  ;;  %v3013_v44 = vor.u32 %v4020_v29, %v3012_v26  ;;  %v3017_v45 = vor.u32 %v4004_v30, %v3014_v31  ;;  %v3550_v24 = vld [vmem:[#allocation10 + $0x4e8] sm:$0xf0] }
 0x239   :  { %v3021_v49 = vor.u32 %v4021_v35, %v3020_v34  ;;  %v3549_v29 = vor.u32 %v4151_v22, %v3548_v21  ;;  %v3553_v30 = vor.u32 %v4135_v23, %v3550_v24  ;;  %v3420_v34 = vld [vmem:[#allocation10 + $0x368] sm:$0xf]  ;;  %v4248_v21 = vld [vmem:[#allocation10 + $0x7ec] sm:$0xf0]  ;;  %v4232_v22 = vld [vmem:[#allocation10 + $0x774] sm:$0xf] }
 0x23a   :  { %v3942_v23 = vld [vmem:[#allocation10 + $0x7f0] sm:$0xf0]  ;;  %v3948_v24 = vld [vmem:[#allocation10 + $0x778] sm:$0xf] }
 0x23b   :  { %2369 = vmatpush.bf16.msra.mxu1 %v3653_v41  ;;  %2382 = vmatpush.bf16.msra.mxu2 %v3657_v43  ;;  %v3926_v41 = vld [vmem:[#allocation10 + $0x7e0] sm:$0xf0]  ;;  %v3932_v43 = vld [vmem:[#allocation10 + $0x768] sm:$0xf] }
 0x23c   :  { %2395 = vmatpush.bf16.msra.mxu3 %v3661_v46  ;;  %2408 = vmatpush.bf16.msrb.mxu0 %v3665_v47  ;;  %v4247_v46 = vld [vmem:[#allocation10 + $0x7e4] sm:$0xf0]  ;;  %v4231_v47 = vld [vmem:[#allocation10 + $0x76c] sm:$0xf]  ;;  %v3929_v52 = vor.u32 %v4230_v40, %v3926_v41 }
 0x23d   :  { %v3937_v56 = vor.u32 %v4231_v47, %v3934_v48  ;;  %v3425_v47 = vor.u32 %v4103_v37, %v3422_v38  ;;  %v4070_v48 = vld [vmem:[#allocation10 + $0x264] sm:$0xf]  ;;  %v3812_v38 = vld [vmem:[#allocation10 + $0x670] sm:$0xf] }
 0x23f   :  { %2370 = vmatpush.bf16.msra.mxu1 %v3525_v54  ;;  %2383 = vmatpush.bf16.msra.mxu2 %v3529_v55  ;;  %v4214_v54 = vld [vmem:[#allocation10 + $0x6dc] sm:$0xf0]  ;;  %v3933_v55 = vor.u32 %v4247_v46, %v3932_v43  ;;  %v3421_v46 = vor.u32 %v4119_v36, %v3420_v34  ;;  %v3945_v36 = vor.u32 %v4232_v22, %v3942_v23  ;;  %v4120_v22 = vld [vmem:[#allocation10 + $0x3ec] sm:$0xf0] }
 0x240   :  { %2396 = vmatpush.bf16.msra.mxu3 %v3533_v58  ;;  %2409 = vmatpush.bf16.msrb.mxu0 %v3537_v59  ;;  %v3798_v58 = vld [vmem:[#allocation10 + $0x6e0] sm:$0xf0]  ;;  %v3804_v59 = vld [vmem:[#allocation10 + $0x668] sm:$0xf]  ;;  %v3797_v63 = vor.u32 %v4214_v54, %v3796_v53  ;;  %v3294_v53 = vld [vmem:[#allocation10 + $0x2e8] sm:$0xf0] }
 0x241   :  { %v3801_v0 = vor.u32 %v4198_v57, %v3798_v58  ;;  %v4054_v57 = vld [vmem:[#allocation10 + $0x1dc] sm:$0xf0] }
 0x243   :  { %2371 = vmatpush.bf16.msra.mxu1 %v3397_v2  ;;  %2384 = vmatpush.bf16.msra.mxu2 %v3401_v3  ;;  %v4182_v2 = vld [vmem:[#allocation10 + $0x5dc] sm:$0xf0]  ;;  %v3805_v3 = vor.u32 %v4215_v60, %v3804_v59 }
 0x244   :  { %2397 = vmatpush.bf16.msra.mxu3 %v3405_v6  ;;  %2410 = vmatpush.bf16.msrb.mxu0 %v3409_v7  ;;  %v3670_v6 = vld [vmem:[#allocation10 + $0x5e0] sm:$0xf0]  ;;  %v3676_v7 = vld [vmem:[#allocation10 + $0x568] sm:$0xf]  ;;  %v3669_v12 = vor.u32 %v4182_v2, %v3668_v1  ;;  %v4039_v2 = vld [vmem:[#allocation10 + $0x16c] sm:$0xf] }
 0x245   :  { %v3673_v13 = vor.u32 %v4166_v5, %v3670_v6  ;;  %v3677_v17 = vor.u32 %v4183_v8, %v3676_v7  ;;  %v4055_v1 = vld [vmem:[#allocation10 + $0x1e4] sm:$0xf0]  ;;  %v3028_v5 = vld [vmem:[#allocation10 + $0x60] sm:$0xf]  ;;  %v3161_v7 = vor.u32 %v4038_v61, %v3158_v62  ;;  %v4169_v61 = vld [vmem:[#allocation10 + $0x57c] sm:$0xf] }
 0x246   :  { %v3694_v62 = vld [vmem:[#allocation10 + $0x5f8] sm:$0xf0] }
 0x247   :  { %2372 = vmatpush.bf16.msra.mxu1 %v3269_v14  ;;  %2385 = vmatpush.bf16.msra.mxu2 %v3273_v15  ;;  %v3540_v15 = vld [vmem:[#allocation10 + $0x460] sm:$0xf] }
 0x248   :  { %2398 = vmatpush.bf16.msra.mxu3 %v3277_v18  ;;  %2411 = vmatpush.bf16.msrb.mxu0 %v3281_v19  ;;  %v3681_v18 = vor.u32 %v4167_v9, %v3678_v10  ;;  %v4134_v19 = vld [vmem:[#allocation10 + $0x464] sm:$0xf]  ;;  %v3541_v25 = vor.u32 %v4150_v16, %v3540_v15  ;;  %v4022_v9 = vld [vmem:[#allocation10 + $0xdc] sm:$0xf0]  ;;  %v3036_v16 = vld [vmem:[#allocation10 + $0x68] sm:$0xf] }
 0x249   :  { %v3545_v26 = vor.u32 %v4134_v19, %v3542_v20  ;;  %v4006_v10 = vld [vmem:[#allocation10 + $0x64] sm:$0xf]  ;;  %v3038_v19 = vld [vmem:[#allocation10 + $0xe8] sm:$0xf0]  ;;  %v3940_v20 = vld [vmem:[#allocation10 + $0x770] sm:$0xf] }
 0x24a   :  { %v3941_v34 = vor.u32 %v4248_v21, %v3940_v20  ;;  %v3428_v21 = vld [vmem:[#allocation10 + $0x370] sm:$0xf] }
 0x24b   :  { %2373 = vmatpush.bf16.msra.mxu1 %v3141_v27  ;;  %2386 = vmatpush.bf16.msra.mxu2 %v3145_v28  ;;  %v3412_v27 = vld [vmem:[#allocation10 + $0x360] sm:$0xf] }
 0x24c   :  { %2399 = vmatpush.bf16.msra.mxu3 %v3149_v32  ;;  %2412 = vmatpush.bf16.msrb.mxu0 %v3153_v33  ;;  %v4118_v28 = vld [vmem:[#allocation10 + $0x3dc] sm:$0xf0]  ;;  %v4102_v32 = vld [vmem:[#allocation10 + $0x364] sm:$0xf] }
 0x24d   :  { %v3414_v33 = vld [vmem:[#allocation10 + $0x3e0] sm:$0xf0]  ;;  %v3413_v40 = vor.u32 %v4118_v28, %v3412_v27  ;;  %v4249_v27 = vld [vmem:[#allocation10 + $0x7f4] sm:$0xf0]  ;;  %v4233_v28 = vld [vmem:[#allocation10 + $0x77c] sm:$0xf] }
 0x24e   :  { %v4627_v11 = vpop.f32.mrf.mxu1  ;;  %v3417_v41 = vor.u32 %v4102_v32, %v3414_v33 }
 0x24f   :  { %2374 = vmatpush.bf16.msra.mxu1 %v3013_v44  ;;  %2387 = vmatpush.bf16.msra.mxu2 %v3017_v45  ;;  %v4629_v14 = vpop.f32.mrf.mxu0  ;;  %v3284_v44 = vld [vmem:[#allocation10 + $0x260] sm:$0xf] }
 0x250   :  { %2400 = vmatpush.bf16.msra.mxu3 %v3021_v49  ;;  %2413 = vmatpush.bf16.msrb.mxu0 %v3025_v50  ;;  %v4086_v45 = vld [vmem:[#allocation10 + $0x2dc] sm:$0xf0]  ;;  %v3286_v49 = vld [vmem:[#allocation10 + $0x2e0] sm:$0xf0]  ;;  %v3292_v50 = vld [vmem:[#allocation10 + $0x268] sm:$0xf] }
 0x251   :  { %v3285_v54 = vor.u32 %v4086_v45, %v3284_v44  ;;  %v4200_v44 = vld [vmem:[#allocation10 + $0x674] sm:$0xf] }
 0x252   :  { %2375 = vmatmul.bf16.vlgmr.msra.gmra.mxu1 %v4601_v42  ;;  %2388 = vmatmul.bf16.vlgmr.msra.gmra.mxu2 %v4601_v42  ;;  %v3814_v45 = vld [vmem:[#allocation10 + $0x6f0] sm:$0xf0] }
 0x253   :  { %2419 = vmatpush.bf16.msrb.mxu1 %v3925_v51  ;;  %2432 = vmatpush.bf16.msrb.mxu2 %v3929_v52  ;;  %v4087_v51 = vld [vmem:[#allocation10 + $0x2e4] sm:$0xf0]  ;;  %v4071_v52 = vld [vmem:[#allocation10 + $0x26c] sm:$0xf] }
 0x254   :  { %2445 = vmatpush.bf16.msrb.mxu3 %v3933_v55  ;;  %2458 = vmatpush.bf16.msra.mxu0 %v3937_v56  ;;  %v4631_v31 = vpop.f32.mrf.mxu2  ;;  %v3289_v55 = vor.u32 %v4070_v48, %v3286_v49  ;;  %v3156_v56 = vld [vmem:[#allocation10 + $0x160] sm:$0xf]  ;;  %v3293_v58 = vor.u32 %v4087_v51, %v3292_v50  ;;  %v3297_v59 = vor.u32 %v4071_v52, %v3294_v53  ;;  %v4217_v48 = vld [vmem:[#allocation10 + $0x6f4] sm:$0xf0]  ;;  %v4201_v49 = vld [vmem:[#allocation10 + $0x67c] sm:$0xf] }
 0x255   :  { %2401 = vmatmul.bf16.vlgmr.msra.gmra.mxu3 %v4601_v42  ;;  %2414 = vmatmul.bf16.vlgmr.msrb.gmra.mxu0 %v4601_v42  ;;  %v4633_v35 = vpop.f32.mrf.mxu3  ;;  %v3157_v6 = vor.u32 %v4054_v57, %v3156_v56  ;;  %v3822_v50 = vld [vmem:[#allocation10 + $0x6f8] sm:$0xf0]  ;;  %v3817_v52 = vor.u32 %v4200_v44, %v3814_v45  ;;  %v3684_v53 = vld [vmem:[#allocation10 + $0x570] sm:$0xf]  ;;  %v4168_v57 = vld [vmem:[#allocation10 + $0x574] sm:$0xf] }
 0x256   :  { %v2118_v39 = vpop.f32.mrf.mxu1  ;;  %v3825_v56 = vor.u32 %v4201_v49, %v3822_v50  ;;  %v3302_v44 = vld [vmem:[#allocation10 + $0x2f0] sm:$0xf0]  ;;  %v3308_v45 = vld [vmem:[#allocation10 + $0x278] sm:$0xf]  ;;  %v3310_v49 = vld [vmem:[#allocation10 + $0x2f8] sm:$0xf0] }
 0x257   :  { %2420 = vmatpush.bf16.msrb.mxu1 %v3797_v63  ;;  %2433 = vmatpush.bf16.msrb.mxu2 %v3801_v0  ;;  %v2157_v43 = vpop.f32.mrf.mxu0  ;;  %v3164_v63 = vld [vmem:[#allocation10 + $0x168] sm:$0xf]  ;;  %v4216_v39 = vld [vmem:[#allocation10 + $0x6ec] sm:$0xf0] }
 0x258   :  { %2446 = vmatpush.bf16.msrb.mxu3 %v3805_v3  ;;  %2459 = vmatpush.bf16.msra.mxu0 %v3809_v4  ;;  %v3166_v3 = vld [vmem:[#allocation10 + $0x1e8] sm:$0xf0]  ;;  %v3813_v51 = vor.u32 %v4216_v39, %v3812_v38  ;;  %v4088_v38 = vld [vmem:[#allocation10 + $0x2ec] sm:$0xf0] }
 0x259   :  { %v3169_v15 = vor.u32 %v4039_v2, %v3166_v3  ;;  %v3556_v3 = vld [vmem:[#allocation10 + $0x470] sm:$0xf] }
 0x25b   :  { %2421 = vmatpush.bf16.msrb.mxu1 %v3669_v12  ;;  %2434 = vmatpush.bf16.msrb.mxu2 %v3673_v13  ;;  %v3030_v12 = vld [vmem:[#allocation10 + $0xe0] sm:$0xf0]  ;;  %v3165_v13 = vor.u32 %v4055_v1, %v3164_v63 }
 0x25c   :  { %2447 = vmatpush.bf16.msrb.mxu3 %v3677_v17  ;;  %2460 = vmatpush.bf16.msra.mxu0 %v3681_v18  ;;  %v2131_v60 = vpop.f32.mrf.mxu2  ;;  %v4023_v17 = vld [vmem:[#allocation10 + $0xe4] sm:$0xf0]  ;;  %v4007_v18 = vld [vmem:[#allocation10 + $0x6c] sm:$0xf] }
 0x25d   :  { %v2144_v0 = vpop.f32.mrf.mxu3  ;;  %v3041_v32 = vor.u32 %v4007_v18, %v3038_v19  ;;  %v4185_v60 = vld [vmem:[#allocation10 + $0x5f4] sm:$0xf0] }
 0x25e   :  { %v4635_v4 = vpop.f32.mrf.mxu1 }
 0x25f   :  { %2422 = vmatpush.bf16.msrb.mxu1 %v3541_v25  ;;  %2435 = vmatpush.bf16.msrb.mxu2 %v3545_v26  ;;  %v4637_v8 = vpop.f32.mrf.mxu0  ;;  %v3029_v25 = vor.u32 %v4022_v9, %v3028_v5  ;;  %v3033_v26 = vor.u32 %v4006_v10, %v3030_v12  ;;  %v4152_v5 = vld [vmem:[#allocation10 + $0x4ec] sm:$0xf0]  ;;  %v4136_v9 = vld [vmem:[#allocation10 + $0x474] sm:$0xf]  ;;  %v3564_v12 = vld [vmem:[#allocation10 + $0x478] sm:$0xf] }
 0x260   :  { %2448 = vmatpush.bf16.msrb.mxu3 %v3549_v29  ;;  %2461 = vmatpush.bf16.msra.mxu0 %v3553_v30  ;;  %v3950_v29 = vld [vmem:[#allocation10 + $0x7f8] sm:$0xf0]  ;;  %v3037_v30 = vor.u32 %v4023_v17, %v3036_v16  ;;  %v3558_v10 = vld [vmem:[#allocation10 + $0x4f0] sm:$0xf0]  ;;  %v3557_v19 = vor.u32 %v4152_v5, %v3556_v3  ;;  %v4024_v3 = vld [vmem:[#allocation10 + $0xec] sm:$0xf0] }
 0x261   :  { %v3566_v16 = vld [vmem:[#allocation10 + $0x4f8] sm:$0xf0]  ;;  %v3561_v20 = vor.u32 %v4136_v9, %v3558_v10  ;;  %v4008_v9 = vld [vmem:[#allocation10 + $0x74] sm:$0xf] }
 0x262   :  { %v3046_v10 = vld [vmem:[#allocation10 + $0xf0] sm:$0xf0] }
 0x263   :  { %2423 = vmatpush.bf16.msrb.mxu1 %v3413_v40  ;;  %2436 = vmatpush.bf16.msrb.mxu2 %v3417_v41  ;;  %v3949_v40 = vor.u32 %v4249_v27, %v3948_v24  ;;  %v3953_v41 = vor.u32 %v4233_v28, %v3950_v29  ;;  %v3436_v27 = vld [vmem:[#allocation10 + $0x378] sm:$0xf]  ;;  %v4105_v29 = vld [vmem:[#allocation10 + $0x37c] sm:$0xf] }
 0x264   :  { %2449 = vmatpush.bf16.msrb.mxu3 %v3421_v46  ;;  %2462 = vmatpush.bf16.msra.mxu0 %v3425_v47  ;;  %v4639_v33 = vpop.f32.mrf.mxu2  ;;  %v3820_v46 = vld [vmem:[#allocation10 + $0x678] sm:$0xf] }
 0x265   :  { %v4641_v37 = vpop.f32.mrf.mxu3  ;;  %v4121_v28 = vld [vmem:[#allocation10 + $0x3f4] sm:$0xf0] }
 0x266   :  { %v2170_v43 = vpop.f32.mrf.mxu1  ;;  %v3437_v39 = vor.u32 %v4121_v28, %v3436_v27 }
 0x267   :  { %2424 = vmatpush.bf16.msrb.mxu1 %v3285_v54  ;;  %2437 = vmatpush.bf16.msrb.mxu2 %v3289_v55  ;;  %v2209_v47 = vpop.f32.mrf.mxu0  ;;  %v4184_v54 = vld [vmem:[#allocation10 + $0x5ec] sm:$0xf0]  ;;  %v3821_v55 = vor.u32 %v4217_v48, %v3820_v46  ;;  %v4072_v43 = vld [vmem:[#allocation10 + $0x274] sm:$0xf]  ;;  %v4073_v48 = vld [vmem:[#allocation10 + $0x27c] sm:$0xf] }
 0x268   :  { %2450 = vmatpush.bf16.msrb.mxu3 %v3293_v58  ;;  %2463 = vmatpush.bf16.msra.mxu0 %v3297_v59  ;;  %v3686_v58 = vld [vmem:[#allocation10 + $0x5f0] sm:$0xf0]  ;;  %v3692_v59 = vld [vmem:[#allocation10 + $0x578] sm:$0xf]  ;;  %v3685_v0 = vor.u32 %v4184_v54, %v3684_v53  ;;  %v3305_v53 = vor.u32 %v4072_v43, %v3302_v44  ;;  %v3172_v54 = vld [vmem:[#allocation10 + $0x170] sm:$0xf] }
 0x269   :  { %v3689_v1 = vor.u32 %v4168_v57, %v3686_v58  ;;  %v4089_v47 = vld [vmem:[#allocation10 + $0x2f4] sm:$0xf0]  ;;  %v3313_v57 = vor.u32 %v4073_v48, %v3310_v49  ;;  %v4040_v58 = vld [vmem:[#allocation10 + $0x174] sm:$0xf] }
 0x26b   :  { %2425 = vmatpush.bf16.msrb.mxu1 %v3157_v6  ;;  %2438 = vmatpush.bf16.msrb.mxu2 %v3161_v7  ;;  %v3693_v6 = vor.u32 %v4185_v60, %v3692_v59  ;;  %v3697_v7 = vor.u32 %v4169_v61, %v3694_v62  ;;  %v3174_v59 = vld [vmem:[#allocation10 + $0x1f0] sm:$0xf0]  ;;  %v3180_v60 = vld [vmem:[#allocation10 + $0x178] sm:$0xf]  ;;  %v4041_v62 = vld [vmem:[#allocation10 + $0x17c] sm:$0xf] }
 0x26c   :  { %2451 = vmatpush.bf16.msrb.mxu3 %v3165_v13  ;;  %2464 = vmatpush.bf16.msra.mxu0 %v3169_v15  ;;  %v2183_v63 = vpop.f32.mrf.mxu2  ;;  %v4153_v13 = vld [vmem:[#allocation10 + $0x4f4] sm:$0xf0]  ;;  %v4137_v15 = vld [vmem:[#allocation10 + $0x47c] sm:$0xf] }
 0x26d   :  { %v2196_v2 = vpop.f32.mrf.mxu3  ;;  %v3565_v23 = vor.u32 %v4153_v13, %v3564_v12  ;;  %v3569_v24 = vor.u32 %v4137_v15, %v3566_v16  ;;  %v4057_v61 = vld [vmem:[#allocation10 + $0x1f4] sm:$0xf0]  ;;  %v3182_v63 = vld [vmem:[#allocation10 + $0x1f8] sm:$0xf0] }
 0x26e   :  { %v3044_v2 = vld [vmem:[#allocation10 + $0x70] sm:$0xf]  ;;  %v3181_v5 = vor.u32 %v4057_v61, %v3180_v60  ;;  %v3052_v12 = vld [vmem:[#allocation10 + $0x78] sm:$0xf]  ;;  %v4009_v16 = vld [vmem:[#allocation10 + $0x7c] sm:$0xf] }
 0x26f   :  { %2426 = vmatpush.bf16.msrb.mxu1 %v3029_v25  ;;  %2439 = vmatpush.bf16.msrb.mxu2 %v3033_v26  ;;  %v4647_v17 = vpop.f32.mrf.mxu1  ;;  %v4104_v25 = vld [vmem:[#allocation10 + $0x374] sm:$0xf]  ;;  %v4025_v15 = vld [vmem:[#allocation10 + $0xf4] sm:$0xf0]  ;;  %v756_v60 = vld [vmem:[#allocation11 + $0x8] sm:$0xff] }
 0x270   :  { %2452 = vmatpush.bf16.msrb.mxu3 %v3037_v30  ;;  %2465 = vmatpush.bf16.msra.mxu0 %v3041_v32  ;;  %v3430_v26 = vld [vmem:[#allocation10 + $0x3f0] sm:$0xf0]  ;;  %v3438_v30 = vld [vmem:[#allocation10 + $0x3f8] sm:$0xf0]  ;;  %v3429_v32 = vor.u32 %v4120_v22, %v3428_v21  ;;  %v3049_v21 = vor.u32 %v4008_v9, %v3046_v10  ;;  %v3053_v22 = vor.u32 %v4025_v15, %v3052_v12  ;;  %v773_v12 = vperm.slane %v756_v60, 2 }
 0x272   :  { %2427 = vmatmul.bf16.vlgmr.msrb.gmra.mxu1 %v4601_v42  ;;  %2440 = vmatmul.bf16.vlgmr.msrb.gmra.mxu2 %v4601_v42  ;;  %v4649_v18 = vpop.f32.mrf.mxu0 }
 0x273   :  { %2471 = vmatpush.bf16.msra.mxu1 %v3941_v34  ;;  %2484 = vmatpush.bf16.msra.mxu2 %v3945_v36  ;;  %v3433_v34 = vor.u32 %v4104_v25, %v3430_v26  ;;  %v3300_v36 = vld [vmem:[#allocation10 + $0x270] sm:$0xf] }
 0x274   :  { %2497 = vmatpush.bf16.msra.mxu3 %v3949_v40  ;;  %2510 = vmatpush.bf16.msrb.mxu0 %v3953_v41  ;;  %v3441_v40 = vor.u32 %v4105_v29, %v3438_v30 }
 0x275   :  { %2453 = vmatmul.bf16.vlgmr.msrb.gmra.mxu3 %v4601_v42  ;;  %2466 = vmatmul.bf16.vlgmr.msra.gmra.mxu0 %v4601_v42  ;;  %v4651_v41 = vpop.f32.mrf.mxu2 }
 0x277   :  { %2472 = vmatpush.bf16.msra.mxu1 %v3813_v51  ;;  %2485 = vmatpush.bf16.msra.mxu2 %v3817_v52  ;;  %v2222_v50 = vpop.f32.mrf.mxu1  ;;  %v3301_v52 = vor.u32 %v4088_v38, %v3300_v36  ;;  %v755_v36 = vld [vmem:[#allocation11] sm:$0xff] }
 0x278   :  { %2498 = vmatpush.bf16.msra.mxu3 %v3821_v55  ;;  %2511 = vmatpush.bf16.msrb.mxu0 %v3825_v56  ;;  %v4653_v46 = vpop.f32.mrf.mxu3  ;;  %v4056_v55 = vld [vmem:[#allocation10 + $0x1ec] sm:$0xf0]  ;;  %v3309_v56 = vor.u32 %v4089_v47, %v3308_v45  ;;  %v764_v43 = vperm.slane %v755_v36, 1 }
 0x27a   :  { %v2261_v51 = vpop.f32.mrf.mxu0  ;;  %v4680_v50 = vadd.f32 %v4631_v31, %v764_v43  ;;  %v768_v31 = vperm.slane %v755_v36, 5 }
 0x27b   :  { %2473 = vmatpush.bf16.msra.mxu1 %v3685_v0  ;;  %2486 = vmatpush.bf16.msra.mxu2 %v3689_v1  ;;  %v3173_v0 = vor.u32 %v4056_v55, %v3172_v54  ;;  %v3177_v1 = vor.u32 %v4040_v58, %v3174_v59  ;;  %v770_v58 = vperm.slane %v755_v36, 7 }
 0x27c   :  { %2499 = vmatpush.bf16.msra.mxu3 %v3693_v6  ;;  %2512 = vmatpush.bf16.msrb.mxu0 %v3697_v7  ;;  %v3185_v6 = vor.u32 %v4041_v62, %v3182_v63  ;;  %v4697_v62 = vadd.f32 %v4639_v33, %v768_v31 }
 0x27d   :  { %v2235_v7 = vpop.f32.mrf.mxu2  ;;  %v4694_v61 = vadd.f32 %v4637_v8, %v770_v58  ;;  %v772_v8 = vperm.slane %v756_v60, 1 }
 0x27f   :  { %2474 = vmatpush.bf16.msra.mxu1 %v3557_v19  ;;  %2487 = vmatpush.bf16.msra.mxu2 %v3561_v20  ;;  %v3054_v19 = vld [vmem:[#allocation10 + $0xf8] sm:$0xf0]  ;;  %v3045_v20 = vor.u32 %v4024_v3, %v3044_v2  ;;  %v4713_v10 = vadd.f32 %v4651_v41, %v772_v8  ;;  %v776_v41 = vperm.slane %v756_v60, 5 }
 0x280   :  { %2500 = vmatpush.bf16.msra.mxu3 %v3565_v23  ;;  %2513 = vmatpush.bf16.msrb.mxu0 %v3569_v24  ;;  %v2248_v13 = vpop.f32.mrf.mxu3  ;;  %v3057_v23 = vor.u32 %v4009_v16, %v3054_v19 }
 0x281   :  { %v775_v13 = vperm.slane %v756_v60, 4 }
 0x283   :  { %2475 = vmatpush.bf16.msra.mxu1 %v3429_v32  ;;  %2488 = vmatpush.bf16.msra.mxu2 %v3433_v34 }
 0x284   :  { %2501 = vmatpush.bf16.msra.mxu3 %v3437_v39  ;;  %2514 = vmatpush.bf16.msrb.mxu0 %v3441_v40  ;;  %v763_v39 = vperm.slane %v755_v36, 0  ;;  %v766_v40 = vperm.slane %v755_v36, 3 }
 0x286   :  { %v4674_v45 = vadd.f32 %v4627_v11, %v763_v39  ;;  %v4677_v47 = vadd.f32 %v4629_v14, %v766_v40  ;;  %v777_v40 = vperm.slane %v756_v60, 6 }
 0x287   :  { %2476 = vmatpush.bf16.msra.mxu1 %v3301_v52  ;;  %2489 = vmatpush.bf16.msra.mxu2 %v3305_v53  ;;  %v765_v52 = vperm.slane %v755_v36, 2  ;;  %v767_v53 = vperm.slane %v755_v36, 4 }
 0x288   :  { %2502 = vmatpush.bf16.msra.mxu3 %v3309_v56  ;;  %2515 = vmatpush.bf16.msrb.mxu0 %v3313_v57  ;;  %v2523_v51 = vmax.f32 %v4674_v45, %v4677_v47 }
 0x289   :  { %v4686_v11 = vadd.f32 %v4633_v35, %v765_v52  ;;  %v4689_v14 = vadd.f32 %v4635_v4, %v767_v53  ;;  %v769_v35 = vperm.slane %v755_v36, 6 }
 0x28a   :  { %v2526_v54 = vmax.f32 %v4680_v50, %v2523_v51 }
 0x28b   :  { %2477 = vmatpush.bf16.msra.mxu1 %v3173_v0  ;;  %2490 = vmatpush.bf16.msra.mxu2 %v3177_v1  ;;  %v771_v0 = vperm.slane %v756_v60, 0  ;;  %v4702_v1 = vadd.f32 %v4641_v37, %v769_v35 }
 0x28c   :  { %2503 = vmatpush.bf16.msra.mxu3 %v3181_v5  ;;  %2516 = vmatpush.bf16.msrb.mxu0 %v3185_v6  ;;  %v2524_v57 = vmax.f32 %v4686_v11, %v2526_v54  ;;  %v774_v5 = vperm.slane %v756_v60, 3 }
 0x28d   :  { %v4705_v2 = vadd.f32 %v4647_v17, %v771_v0 }
 0x28e   :  { %v2525_v59 = vmax.f32 %v4689_v14, %v2524_v57  ;;  %v4710_v9 = vadd.f32 %v4649_v18, %v774_v5 }
 0x28f   :  { %2478 = vmatpush.bf16.msra.mxu1 %v3045_v20  ;;  %2491 = vmatpush.bf16.msra.mxu2 %v3049_v21  ;;  %v2272_v24 = vpop.f32.mrf.mxu1  ;;  %v4718_v21 = vadd.f32 %v4653_v46, %v773_v12 }
 0x290   :  { %2504 = vmatpush.bf16.msra.mxu3 %v3053_v22  ;;  %2517 = vmatpush.bf16.msrb.mxu0 %v3057_v23  ;;  %v2527_v63 = vmax.f32 %v4694_v61, %v2525_v59  ;;  %v4720_v22 = vadd.f32 %v2272_v24, %v775_v13  ;;  %v778_v23 = vperm.slane %v756_v60, 7 }
 0x292   :  { %2479 = vmatmul.bf16.vlgmr.msra.gmra.mxu1 %v4601_v42  ;;  %2492 = vmatmul.bf16.vlgmr.msra.gmra.mxu2 %v4601_v42  ;;  %v4659_v25 = vpop.f32.mrf.mxu0  ;;  %v2530_v4 = vmax.f32 %v4697_v62, %v2527_v63 }
 0x293   :  { %2505 = vmatmul.bf16.vlgmr.msra.gmra.mxu3 %v4601_v42  ;;  %2518 = vmatmul.bf16.vlgmr.msrb.gmra.mxu0 %v4601_v42  ;;  %v4725_v36 = vadd.f32 %v4659_v25, %v778_v23 }
 0x294   :  { %v2528_v3 = vmax.f32 %v4702_v1, %v2530_v4 }
 0x295   :  { %v4661_v26 = vpop.f32.mrf.mxu2 }
 0x296   :  { %v2529_v33 = vmax.f32 %v4705_v2, %v2528_v3  ;;  %v4728_v39 = vadd.f32 %v4661_v26, %v776_v41  ;;  %v758_v3 = vld [vmem:[#allocation11 + $0x18] sm:$0xff] }
 0x297   :  { %v2274_v28 = vpop.f32.mrf.mxu1  ;;  %v790_v23 = vperm.slane %v758_v3, 3  ;;  %v788_v41 = vperm.slane %v758_v3, 1 }
 0x298   :  { %v4663_v27 = vpop.f32.mrf.mxu3  ;;  %v2531_v37 = vmax.f32 %v4710_v9, %v2529_v33 }
 0x29a   :  { %v2313_v29 = vpop.f32.mrf.mxu0  ;;  %v2534_v16 = vmax.f32 %v4713_v10, %v2531_v37 }
 0x29c   :  { %v2532_v18 = vmax.f32 %v4718_v21, %v2534_v16 }
 0x29d   :  { %v2287_v30 = vpop.f32.mrf.mxu2 }
 0x29e   :  { %v2533_v28 = vmax.f32 %v4720_v22, %v2532_v18  ;;  %v757_v30 = vld [vmem:[#allocation11 + $0x10] sm:$0xff] }
 0x29f   :  { %v779_v24 = vperm.slane %v757_v30, 0  ;;  %v782_v52 = vperm.slane %v757_v30, 3  ;;  %v780_v25 = vperm.slane %v757_v30, 1  ;;  %v784_v63 = vperm.slane %v757_v30, 5 }
 0x2a0   :  { %v2300_v32 = vpop.f32.mrf.mxu3  ;;  %v2535_v46 = vmax.f32 %v4725_v36, %v2533_v28  ;;  %v785_v37 = vperm.slane %v757_v30, 6 }
 0x2a2   :  { %v2538_v43 = vmax.f32 %v4728_v39, %v2535_v46  ;;  %v791_v46 = vperm.slane %v758_v3, 4 }
 0x2af   :  { %v4665_v34 = vpop.f32.mrf.mxu1 }
 0x2b2   :  { %v4667_v38 = vpop.f32.mrf.mxu0 }
 0x2b3   :  { %v4741_v26 = vadd.f32 %v4667_v38, %v782_v52  ;;  %v786_v38 = vperm.slane %v757_v30, 7 }
 0x2b5   :  { %v4669_v42 = vpop.f32.mrf.mxu2 }
 0x2b6   :  { %v4744_v54 = vadd.f32 %v4669_v42, %v780_v25 }
 0x2b7   :  { %v2326_v48 = vpop.f32.mrf.mxu1 }
 0x2b8   :  { %v4671_v44 = vpop.f32.mrf.mxu3  ;;  %v4733_v48 = vadd.f32 %v4663_v27, %v777_v40  ;;  %v783_v27 = vperm.slane %v757_v30, 4 }
 0x2ba   :  { %v2365_v49 = vpop.f32.mrf.mxu0  ;;  %v2536_v51 = vmax.f32 %v4733_v48, %v2538_v43 }
 0x2bb   :  { %v4736_v49 = vadd.f32 %v4665_v34, %v779_v24 }
 0x2bd   :  { %v2339_v55 = vpop.f32.mrf.mxu2  ;;  %v2537_v53 = vmax.f32 %v4736_v49, %v2536_v51  ;;  %v794_v51 = vperm.slane %v758_v3, 7 }
 0x2bf   :  { %v2539_v55 = vmax.f32 %v4741_v26, %v2537_v53  ;;  %v792_v53 = vperm.slane %v758_v3, 5 }
 0x2c0   :  { %v2352_v56 = vpop.f32.mrf.mxu3 }
 0x2c1   :  { %v781_v56 = vperm.slane %v757_v30, 2  ;;  %v2542_v34 = vmax.f32 %v4744_v54, %v2539_v55  ;;  %v789_v30 = vperm.slane %v758_v3, 2 }
 0x2c3   :  { %v4749_v31 = vadd.f32 %v4671_v44, %v781_v56  ;;  %v793_v56 = vperm.slane %v758_v3, 6 }
 0x2c5   :  { %v2540_v60 = vmax.f32 %v4749_v31, %v2542_v34 }
 0x2cf   :  { %v2376_v6 = vpop.f32.mrf.mxu1 }
 0x2d0   :  { %v4751_v59 = vadd.f32 %v2376_v6, %v783_v27  ;;  %v787_v6 = vperm.slane %v758_v3, 0 }
 0x2d2   :  { %v2415_v7 = vpop.f32.mrf.mxu0  ;;  %v2541_v0 = vmax.f32 %v4751_v59, %v2540_v60 }
 0x2d3   :  { %v4755_v8 = vadd.f32 %v2415_v7, %v786_v38 }
 0x2d5   :  { %v2389_v17 = vpop.f32.mrf.mxu2  ;;  %v2543_v44 = vmax.f32 %v4755_v8, %v2541_v0 }
 0x2d6   :  { %v4757_v33 = vadd.f32 %v2389_v17, %v784_v63 }
 0x2d7   :  { %v2378_v19 = vpop.f32.mrf.mxu1 }
 0x2d8   :  { %v2402_v15 = vpop.f32.mrf.mxu3  ;;  %v2546_v12 = vmax.f32 %v4757_v33, %v2543_v44 }
 0x2d9   :  { %v4761_v19 = vadd.f32 %v2402_v15, %v785_v37 }
 0x2da   :  { %v2417_v20 = vpop.f32.mrf.mxu0 }
 0x2db   :  { %v2544_v18 = vmax.f32 %v4761_v19, %v2546_v12 }
 0x2dd   :  { %v2391_v29 = vpop.f32.mrf.mxu2 }
 0x2e0   :  { %v2404_v32 = vpop.f32.mrf.mxu3 }
 0x2ef   :  { %v2428_v57 = vpop.f32.mrf.mxu1 }
 0x2f0   :  { %v4763_v20 = vadd.f32 %v2428_v57, %v787_v6 }
 0x2f2   :  { %v2467_v58 = vpop.f32.mrf.mxu0  ;;  %v2545_v7 = vmax.f32 %v4763_v20, %v2544_v18 }
 0x2f3   :  { %v4767_v17 = vadd.f32 %v2467_v58, %v790_v23 }
 0x2f5   :  { %v2441_v35 = vpop.f32.mrf.mxu2  ;;  %v2547_v29 = vmax.f32 %v4767_v17, %v2545_v7 }
 0x2f6   :  { %v4769_v28 = vadd.f32 %v2441_v35, %v788_v41 }
 0x2f7   :  { %v2430_v4 = vpop.f32.mrf.mxu1 }
 0x2f8   :  { %v2454_v42 = vpop.f32.mrf.mxu3  ;;  %v2550_v32 = vmax.f32 %v4769_v28, %v2547_v29 }
 0x2f9   :  { %v4773_v15 = vadd.f32 %v2454_v42, %v789_v30 }
 0x2fa   :  { %v2469_v5 = vpop.f32.mrf.mxu0 }
 0x2fb   :  { %v2548_v24 = vmax.f32 %v4773_v15, %v2550_v32 }
 0x2fd   :  { %v2443_v13 = vpop.f32.mrf.mxu2 }
 0x300   :  { %v2456_v16 = vpop.f32.mrf.mxu3 }
 0x30f   :  { %v2480_v40 = vpop.f32.mrf.mxu1 }
 0x310   :  { %v4776_v43 = vadd.f32 %v2480_v40, %v791_v46  ;;  %v2519_v52 = vpop.f32.mrf.mxu0 }
 0x311   :  { %v4779_v55 = vadd.f32 %v2519_v52, %v794_v51 }
 0x312   :  { %v2549_v25 = vmax.f32 %v4776_v43, %v2548_v24 }
 0x314   :  { %v2551_v57 = vmax.f32 %v4779_v55, %v2549_v25 }
 0x315   :  { %v2493_v27 = vpop.f32.mrf.mxu2 }
 0x316   :  { %v4782_v58 = vadd.f32 %v2493_v27, %v792_v53  ;;  %v2506_v34 = vpop.f32.mrf.mxu3 }
 0x317   :  { %v2482_v60 = vpop.f32.mrf.mxu1  ;;  %v4785_v63 = vadd.f32 %v2506_v34, %v793_v56 }
 0x318   :  { %v2552_v38 = vmax.f32 %v4782_v58, %v2551_v57  ;;  %v2521_v35 = vpop.f32.mrf.mxu0 }
 0x31a   :  { %v2553_v42 = vmax.f32 %v4785_v63, %v2552_v38 }
 0x31c   :  { %2554 = vmax.xlane.f32.xlu0 %v2553_v42 }
 0x31d   :  { %v2495_v0 = vpop.f32.mrf.mxu2 }
 0x31e   :  { %v2508_v4 = vpop.f32.mrf.mxu3 }
 0x38f   :  { %v4788_v5 = vpop.xlane.xlu0 %2554 }
 0x390   :  { %v2556_v3 = vsub.f32 %v4674_v45, %v4788_v5  ;;  %v2557_v44 = vsub.f32 %v4680_v50, %v4788_v5  ;;  %v2558_v37 = vsub.f32 %v4686_v11, %v4788_v5  ;;  %v2559_v6 = vsub.f32 %v4677_v47, %v4788_v5 }
 0x391   :  { %v2560_v16 = vsub.f32 %v4689_v14, %v4788_v5  ;;  %v2561_v23 = vsub.f32 %v4697_v62, %v4788_v5  ;;  %v2562_v50 = vsub.f32 %v4702_v1, %v4788_v5  ;;  %v2563_v47 = vsub.f32 %v4694_v61, %v4788_v5 }
 0x392   :  { %v2588_v12 = vmul.f32 1.442695, %v2556_v3  ;;  %v2590_v13 = vmul.f32 1.442695, %v2557_v44  ;;  %v2592_v18 = vmul.f32 1.442695, %v2558_v37  ;;  %v2564_v29 = vsub.f32 %v4705_v2, %v4788_v5 }
 0x393   :  { %v2594_v45 = vmul.f32 1.442695, %v2559_v6  ;;  %v2596_v11 = vmul.f32 1.442695, %v2560_v16  ;;  %v2598_v41 = vmul.f32 1.442695, %v2561_v23  ;;  %v2565_v32 = vsub.f32 %v4713_v10, %v4788_v5 }
 0x394   :  { %4264 = vpow2.f32 %v2588_v12  ;;  %v2600_v62 = vmul.f32 1.442695, %v2562_v50  ;;  %v2602_v61 = vmul.f32 1.442695, %v2563_v47  ;;  %v2566_v24 = vsub.f32 %v4718_v21, %v4788_v5 }
 0x395   :  { %4266 = vpow2.f32 %v2590_v13  ;;  %v2604_v2 = vmul.f32 1.442695, %v2564_v29  ;;  %v2567_v25 = vsub.f32 %v4710_v9, %v4788_v5  ;;  %v2606_v10 = vmul.f32 1.442695, %v2565_v32 }
 0x396   :  { %4268 = vpow2.f32 %v2592_v18  ;;  %v2568_v27 = vsub.f32 %v4720_v22, %v4788_v5  ;;  %v2608_v21 = vmul.f32 1.442695, %v2566_v24  ;;  %v2569_v60 = vsub.f32 %v4728_v39, %v4788_v5 }
 0x397   :  { %4270 = vpow2.f32 %v2594_v45  ;;  %v2610_v9 = vmul.f32 1.442695, %v2567_v25  ;;  %v2570_v42 = vsub.f32 %v4733_v48, %v4788_v5  ;;  %v2571_v3 = vsub.f32 %v4725_v36, %v4788_v5 }
 0x398   :  { %4272 = vpow2.f32 %v2596_v11  ;;  %v2612_v22 = vmul.f32 1.442695, %v2568_v27  ;;  %v2614_v39 = vmul.f32 1.442695, %v2569_v60  ;;  %v2572_v6 = vsub.f32 %v4736_v49, %v4788_v5 }
 0x399   :  { %4274 = vpow2.f32 %v2598_v41  ;;  %v2616_v48 = vmul.f32 1.442695, %v2570_v42  ;;  %v2573_v16 = vsub.f32 %v4744_v54, %v4788_v5  ;;  %v2618_v36 = vmul.f32 1.442695, %v2571_v3 }
 0x39a   :  { %v4806_v7 = vpop.eup %4264  ;;  %4276 = vpow2.f32 %v2600_v62  ;;  %v2574_v45 = vsub.f32 %v4749_v31, %v4788_v5  ;;  %v2620_v49 = vmul.f32 1.442695, %v2572_v6  ;;  %v2575_v47 = vsub.f32 %v4741_v26, %v4788_v5 }
 0x39b   :  { %v4808_v14 = vpop.eup %4266  ;;  %4278 = vpow2.f32 %v2602_v61  ;;  %v2622_v54 = vmul.f32 1.442695, %v2573_v16  ;;  %v2576_v62 = vsub.f32 %v4751_v59, %v4788_v5  ;;  %v2577_v61 = vsub.f32 %v4757_v33, %v4788_v5 }
 0x39c   :  { %v2652_v30 = vadd.f32 %v4808_v14, %v4806_v7  ;;  %v4814_v1 = vpop.eup %4268  ;;  %4280 = vpow2.f32 %v2604_v2  ;;  %v2624_v31 = vmul.f32 1.442695, %v2574_v45  ;;  %v2626_v26 = vmul.f32 1.442695, %v2575_v47 }
 0x39d   :  { %v4819_v40 = vpop.eup %4270  ;;  %4282 = vpow2.f32 %v2606_v10  ;;  %v2578_v2 = vsub.f32 %v4761_v19, %v4788_v5  ;;  %v2628_v59 = vmul.f32 1.442695, %v2576_v62  ;;  %v2579_v10 = vsub.f32 %v4755_v8, %v4788_v5 }
 0x39e   :  { %v2653_v46 = vadd.f32 %v4814_v1, %v2652_v30  ;;  %v4824_v52 = vpop.eup %4272  ;;  %4284 = vpow2.f32 %v2608_v21  ;;  %v2630_v33 = vmul.f32 1.442695, %v2577_v61  ;;  %v2580_v21 = vsub.f32 %v4763_v20, %v4788_v5 }
 0x39f   :  { %v4829_v56 = vpop.eup %4274  ;;  %4286 = vpow2.f32 %v2610_v9  ;;  %v2632_v19 = vmul.f32 1.442695, %v2578_v2  ;;  %v2581_v9 = vsub.f32 %v4769_v28, %v4788_v5  ;;  %v2634_v8 = vmul.f32 1.442695, %v2579_v10 }
 0x3a0   :  { %v2654_v51 = vadd.f32 %v4819_v40, %v2653_v46  ;;  %v4834_v34 = vpop.eup %4276  ;;  %4288 = vpow2.f32 %v2612_v22  ;;  %v2582_v22 = vsub.f32 %v4773_v15, %v4788_v5  ;;  %v2636_v20 = vmul.f32 1.442695, %v2580_v21 }
 0x3a1   :  { %v4839_v35 = vpop.eup %4278  ;;  %4290 = vpow2.f32 %v2614_v39  ;;  %v2583_v39 = vsub.f32 %v4767_v17, %v4788_v5  ;;  %v2638_v28 = vmul.f32 1.442695, %v2581_v9 }
 0x3a2   :  { %v2655_v53 = vadd.f32 %v4824_v52, %v2654_v51  ;;  %v4844_v4 = vpop.eup %4280  ;;  %4292 = vpow2.f32 %v2616_v48  ;;  %v2584_v48 = vsub.f32 %v4776_v43, %v4788_v5  ;;  %v2640_v15 = vmul.f32 1.442695, %v2582_v22 }
 0x3a3   :  { %v4849_v37 = vpop.eup %4282  ;;  %4294 = vpow2.f32 %v2618_v36  ;;  %v2585_v36 = vsub.f32 %v4782_v58, %v4788_v5  ;;  %v2642_v17 = vmul.f32 1.442695, %v2583_v39 }
 0x3a4   :  { %v2656_v57 = vadd.f32 %v4829_v56, %v2655_v53  ;;  %v4854_v13 = vpop.eup %4284  ;;  %4296 = vpow2.f32 %v2620_v49  ;;  %v2586_v49 = vsub.f32 %v4785_v63, %v4788_v5  ;;  %v2644_v43 = vmul.f32 1.442695, %v2584_v48 }
 0x3a5   :  { %v4859_v23 = vpop.eup %4286  ;;  %4298 = vpow2.f32 %v2622_v54  ;;  %v2587_v54 = vsub.f32 %v4779_v55, %v4788_v5  ;;  %v2646_v58 = vmul.f32 1.442695, %v2585_v36 }
 0x3a6   :  { %v2657_v38 = vadd.f32 %v4834_v34, %v2656_v57  ;;  %v4864_v11 = vpop.eup %4288  ;;  %4300 = vpow2.f32 %v2624_v31  ;;  %v2648_v31 = vmul.f32 1.442695, %v2586_v49 }
 0x3a7   :  { %v4869_v29 = vpop.eup %4290  ;;  %4302 = vpow2.f32 %v2626_v26  ;;  %v2650_v61 = vmul.f32 1.442695, %v2587_v54 }
 0x3a8   :  { %v2658_v0 = vadd.f32 %v4839_v35, %v2657_v38  ;;  %v4874_v32 = vpop.eup %4292  ;;  %4304 = vpow2.f32 %v2628_v59 }
 0x3a9   :  { %v4879_v24 = vpop.eup %4294  ;;  %4306 = vpow2.f32 %v2630_v33 }
 0x3aa   :  { %v2659_v44 = vadd.f32 %v4844_v4, %v2658_v0  ;;  %v4884_v25 = vpop.eup %4296  ;;  %4308 = vpow2.f32 %v2632_v19 }
 0x3ab   :  { %v4889_v27 = vpop.eup %4298  ;;  %4310 = vpow2.f32 %v2634_v8 }
 0x3ac   :  { %v2660_v12 = vadd.f32 %v4849_v37, %v2659_v44  ;;  %v4894_v60 = vpop.eup %4300  ;;  %4312 = vpow2.f32 %v2636_v20 }
 0x3ad   :  { %v4899_v42 = vpop.eup %4302  ;;  %4314 = vpow2.f32 %v2638_v28 }
 0x3ae   :  { %v2661_v18 = vadd.f32 %v4854_v13, %v2660_v12  ;;  %v4904_v3 = vpop.eup %4304  ;;  %4316 = vpow2.f32 %v2640_v15 }
 0x3af   :  { %v4909_v6 = vpop.eup %4306  ;;  %4318 = vpow2.f32 %v2642_v17 }
 0x3b0   :  { %v2662_v50 = vadd.f32 %v4859_v23, %v2661_v18  ;;  %v4914_v16 = vpop.eup %4308  ;;  %4320 = vpow2.f32 %v2644_v43 }
 0x3b1   :  { %v4919_v45 = vpop.eup %4310  ;;  %4322 = vpow2.f32 %v2646_v58 }
 0x3b2   :  { %v2663_v41 = vadd.f32 %v4864_v11, %v2662_v50  ;;  %v4924_v47 = vpop.eup %4312  ;;  %4324 = vpow2.f32 %v2648_v31 }
 0x3b3   :  { %v4929_v62 = vpop.eup %4314  ;;  %4326 = vpow2.f32 %v2650_v61 }
 0x3b4   :  { %v2664_v30 = vadd.f32 %v4869_v29, %v2663_v41  ;;  %v4932_v63 = vpop.eup %4316 }
 0x3b6   :  { %v2665_v46 = vadd.f32 %v4874_v32, %v2664_v30 }
 0x3b8   :  { %v2666_v51 = vadd.f32 %v4879_v24, %v2665_v46  ;;  %v4935_v46 = vpop.eup %4318 }
 0x3b9   :  { %v4938_v5 = vpop.eup %4320 }
 0x3ba   :  { %v2667_v53 = vadd.f32 %v4884_v25, %v2666_v51  ;;  %v4941_v59 = vpop.eup %4322 }
 0x3bb   :  { %v4944_v10 = vpop.eup %4324 }
 0x3bc   :  { %v2668_v57 = vadd.f32 %v4889_v27, %v2667_v53  ;;  %v4947_v53 = vpop.eup %4326 }
 0x3be   :  { %v2669_v38 = vadd.f32 %v4894_v60, %v2668_v57 }
 0x3c0   :  { %v2670_v0 = vadd.f32 %v4899_v42, %v2669_v38 }
 0x3c2   :  { %v2671_v44 = vadd.f32 %v4904_v3, %v2670_v0 }
 0x3c4   :  { %v2672_v12 = vadd.f32 %v4909_v6, %v2671_v44 }
 0x3c6   :  { %v2673_v18 = vadd.f32 %v4914_v16, %v2672_v12 }
 0x3c8   :  { %v2674_v50 = vadd.f32 %v4919_v45, %v2673_v18 }
 0x3ca   :  { %v2675_v41 = vadd.f32 %v4924_v47, %v2674_v50 }
 0x3cc   :  { %v2676_v30 = vadd.f32 %v4929_v62, %v2675_v41 }
 0x3ce   :  { %v2677_v26 = vadd.f32 %v4932_v63, %v2676_v30 }
 0x3d0   :  { %v2678_v55 = vadd.f32 %v4935_v46, %v2677_v26 }
 0x3d2   :  { %v2679_v2 = vadd.f32 %v4938_v5, %v2678_v55 }
 0x3d4   :  { %v2680_v51 = vadd.f32 %v4941_v59, %v2679_v2 }
 0x3d6   :  { %v2681_v33 = vadd.f32 %v4944_v10, %v2680_v51 }
 0x3d8   :  { %v2682_v21 = vadd.f32 %v4947_v53, %v2681_v33 }
 0x3da   :  { %2683 = vadd.xlane.f32.xlu0 %v2682_v21 }
 0x44d   :  { %v2684_v19 = vpop.xlane.xlu0 %2683 }
 0x44e   :  { %4328 = vrcp.f32 %v2684_v19 }
 0x454   :  { %v4329_v57 = vpop.eup %4328 }
 0x455   :  { %v2686_v9 = vmul.f32 %v4329_v57, %v4806_v7  ;;  %v2687_v8 = vmul.f32 %v4329_v57, %v4808_v14  ;;  %v2688_v38 = vmul.f32 %v4329_v57, %v4814_v1  ;;  %v2689_v22 = vmul.f32 %v4329_v57, %v4819_v40 }
 0x456   :  { %v2690_v20 = vmul.f32 %v4329_v57, %v4824_v52  ;;  %v2691_v0 = vmul.f32 %v4329_v57, %v4829_v56  ;;  %v2692_v39 = vmul.f32 %v4329_v57, %v4834_v34  ;;  %v2693_v28 = vmul.f32 %v4329_v57, %v4839_v35 }
 0x457   :  { %2718 = vst [vmem:[#allocation13] sm:$0xff] %v2686_v9  ;;  %v2694_v7 = vmul.f32 %v4329_v57, %v4844_v4  ;;  %v2695_v14 = vmul.f32 %v4329_v57, %v4849_v37  ;;  %v2696_v1 = vmul.f32 %v4329_v57, %v4854_v13  ;;  %v2697_v40 = vmul.f32 %v4329_v57, %v4859_v23 }
 0x458   :  { %2719 = vst [vmem:[#allocation13 + $0x8] sm:$0xff] %v2687_v8  ;;  %v2698_v52 = vmul.f32 %v4329_v57, %v4864_v11  ;;  %v2699_v56 = vmul.f32 %v4329_v57, %v4869_v29  ;;  %v2700_v34 = vmul.f32 %v4329_v57, %v4874_v32  ;;  %v2701_v35 = vmul.f32 %v4329_v57, %v4879_v24 }
 0x459   :  { %2720 = vst [vmem:[#allocation13 + $0x10] sm:$0xff] %v2688_v38  ;;  %v2702_v4 = vmul.f32 %v4329_v57, %v4884_v25  ;;  %v2703_v37 = vmul.f32 %v4329_v57, %v4889_v27  ;;  %v2704_v13 = vmul.f32 %v4329_v57, %v4894_v60  ;;  %v2705_v23 = vmul.f32 %v4329_v57, %v4899_v42 }
 0x45a   :  { %2721 = vst [vmem:[#allocation13 + $0x18] sm:$0xff] %v2689_v22  ;;  %v2706_v11 = vmul.f32 %v4329_v57, %v4904_v3  ;;  %v2707_v29 = vmul.f32 %v4329_v57, %v4909_v6  ;;  %v2708_v32 = vmul.f32 %v4329_v57, %v4914_v16  ;;  %v2709_v24 = vmul.f32 %v4329_v57, %v4919_v45 }
 0x45b   :  { %2722 = vst [vmem:[#allocation13 + $0x20] sm:$0xff] %v2690_v20  ;;  %v2710_v25 = vmul.f32 %v4329_v57, %v4924_v47  ;;  %v2711_v27 = vmul.f32 %v4329_v57, %v4929_v62  ;;  %v2712_v60 = vmul.f32 %v4329_v57, %v4932_v63  ;;  %v2713_v42 = vmul.f32 %v4329_v57, %v4935_v46 }
 0x45c   :  { %2723 = vst [vmem:[#allocation13 + $0x28] sm:$0xff] %v2691_v0  ;;  %v2714_v3 = vmul.f32 %v4329_v57, %v4938_v5  ;;  %v2715_v44 = vmul.f32 %v4329_v57, %v4941_v59  ;;  %v2716_v6 = vmul.f32 %v4329_v57, %v4944_v10  ;;  %v2717_v48 = vmul.f32 %v4329_v57, %v4947_v53 }
 0x45d   :  { %2724 = vst [vmem:[#allocation13 + $0x30] sm:$0xff] %v2692_v39 }
 0x45e   :  { %2725 = vst [vmem:[#allocation13 + $0x38] sm:$0xff] %v2693_v28 }
 0x45f   :  { %2726 = vst [vmem:[#allocation13 + $0x40] sm:$0xff] %v2694_v7 }
 0x460   :  { %2727 = vst [vmem:[#allocation13 + $0x48] sm:$0xff] %v2695_v14 }
 0x461   :  { %2728 = vst [vmem:[#allocation13 + $0x50] sm:$0xff] %v2696_v1 }
 0x462   :  { %2729 = vst [vmem:[#allocation13 + $0x58] sm:$0xff] %v2697_v40 }
 0x463   :  { %2730 = vst [vmem:[#allocation13 + $0x60] sm:$0xff] %v2698_v52 }
 0x464   :  { %2731 = vst [vmem:[#allocation13 + $0x68] sm:$0xff] %v2699_v56 }
 0x465   :  { %2732 = vst [vmem:[#allocation13 + $0x70] sm:$0xff] %v2700_v34 }
 0x466   :  { %2733 = vst [vmem:[#allocation13 + $0x78] sm:$0xff] %v2701_v35 }
 0x467   :  { %2734 = vst [vmem:[#allocation13 + $0x80] sm:$0xff] %v2702_v4 }
 0x468   :  { %2735 = vst [vmem:[#allocation13 + $0x88] sm:$0xff] %v2703_v37 }
 0x469   :  { %2736 = vst [vmem:[#allocation13 + $0x90] sm:$0xff] %v2704_v13 }
 0x46a   :  { %2737 = vst [vmem:[#allocation13 + $0x98] sm:$0xff] %v2705_v23 }
 0x46b   :  { %2738 = vst [vmem:[#allocation13 + $0xa0] sm:$0xff] %v2706_v11 }
 0x46c   :  { %2739 = vst [vmem:[#allocation13 + $0xa8] sm:$0xff] %v2707_v29 }
 0x46d   :  { %2740 = vst [vmem:[#allocation13 + $0xb0] sm:$0xff] %v2708_v32 }
 0x46e   :  { %2741 = vst [vmem:[#allocation13 + $0xb8] sm:$0xff] %v2709_v24 }
 0x46f   :  { %2742 = vst [vmem:[#allocation13 + $0xc0] sm:$0xff] %v2710_v25 }
 0x470   :  { %2743 = vst [vmem:[#allocation13 + $0xc8] sm:$0xff] %v2711_v27 }
 0x471   :  { %2744 = vst [vmem:[#allocation13 + $0xd0] sm:$0xff] %v2712_v60 }
 0x472   :  { %2745 = vst [vmem:[#allocation13 + $0xd8] sm:$0xff] %v2713_v42 }
 0x473   :  { %2746 = vst [vmem:[#allocation13 + $0xe0] sm:$0xff] %v2714_v3 }
 0x474   :  { %2747 = vst [vmem:[#allocation13 + $0xe8] sm:$0xff] %v2715_v44 }
 0x475   :  { %2748 = vst [vmem:[#allocation13 + $0xf0] sm:$0xff] %v2716_v6 }
 0x476   :  { %2749 = vst [vmem:[#allocation13 + $0xf8] sm:$0xff] %v2717_v48 }
 0x477   :  { %2760 = dma.vmem_to_hbm [thread:$0]  %s2756_s21, 4096, %s2758_s1, [#allocation4]  }
 0x478   :  { %4506 = dma.done.wait [#allocation4], 4096  }
 0x479   :  { %4507 = vsyncadd [#allocation4], 4294963200 }
 0x47a   :  { %2765 = vsyncpa [#allocation3], 1 }
 0x47b   :  { %2766 = vsyncpa [#allocation6], 1 }
 0x47c   :  { %2767 = vsyncpa [#allocation9], 1 }
 0x47d   :  { %2768 = vsyncpa [#allocation12], 1 }
 0x47e   :  { %2769 = vsyncpa [#allocation4], 1 }

</bundles_post_ra>
